<compile_context>
chip_gen: v5e
topology: v5e:2x2
jax: 0.10.0
libtpu: 0.0.40
codegen_flags: <defaults>
</compile_context>

<pallas_src>
import functools

import numpy as np
import jax
import jax.numpy as jnp
from jax.experimental import pallas as pl
from jax.experimental.pallas import tpu as pltpu

# ---- small hyperparameters consistent with ConvLSTM.__init__ ----
IN_CHANNELS = 3          # self.IN_CHANNELS (fixed by the module)
N_FEATURES = 8           # n_features
TOTAL_FRAMES = 16        # total_frames (LSTM sequence length after the view)
N_HIDDEN = 32            # n_hidden  (4 * N_HIDDEN = 128 -> exactly one MXU N tile)
N_LANGUAGES = 2          # languages
OUT_CHANNELS = 1         # out_channels
KERNEL = (1, 7)          # kernel -> padding = (0, 3)
BATCH = 2


# --------------------------- single fused kernel ------------------------------
def convlstm_fused_kernel(x_ref, a_ref, bz_ref, whh_ref, wls_ref, bls_ref,
                          out_ref, *, B, Hd, H4, T, n_chunk):
    # x_ref   (Hh*B, C*W)          VMEM  input, rows = (h_row, batch), lanes = (chan, w)
    # a_ref   (C*W, n_chunk*4H)    VMEM  folded conv (x) view (x) W_ih^T weight
    # bz_ref  (1, n_chunk*4H)      VMEM  folded bias (b_ih + b_hh + conv_b * sum_f W_ih^T)
    # whh_ref (Hd, 4H)             VMEM  LSTM W_hh^T
    # wls_ref (Hd, L)              VMEM  language_scores weight^T
    # bls_ref (1, L)               VMEM  language_scores bias
    # out_ref (B, L)               VMEM  log-softmax scores

    # ------------------------------------------------------------------ step 1
    # Fused conv2d + torch `.view(B, W, C_out*H)` + LSTM input projection as a
    # single MXU matmul.  y[hr*B + b, s*4H + col] is the (biased) gate
    # pre-activation contribution of the input for timestep t = hr*n_chunk + s.
    # y is only 4 f32 vregs -> kept in registers, never round-tripped to VMEM.
    y = (jnp.dot(x_ref[...], a_ref[...], preferred_element_type=jnp.float32)
         + bz_ref[...])

    # ------------------------------------------------------------------ step 2
    # LSTM recurrence, fully unrolled (T steps).  Per step: one (B,Hd)x(Hd,4H)
    # MXU matmul against the loop-invariant W_hh (single hoisted value so the
    # RHS can stay staged), full-width sigmoid/tanh over the fused 128-wide gate
    # vector (EUP slot), then one slice per gate.  Gate order matches nn.LSTM:
    # i, f, g, o.  The y-slices do not depend on h_t (off the serial chain).
    whh = whh_ref[...]
    h_t = jnp.zeros((B, Hd), jnp.float32)
    c_t = jnp.zeros((B, Hd), jnp.float32)
    for t in range(T):
        hr, s = divmod(t, n_chunk)
        zin = y[hr * B:(hr + 1) * B, s * H4:(s + 1) * H4]      # (B, 4H)
        z = zin + jnp.dot(h_t, whh, preferred_element_type=jnp.float32)
        sig = jax.nn.sigmoid(z)        # full-width (gates i, f, o live here)
        th = jnp.tanh(z)               # full-width (gate g lives here)
        i_g = sig[:, 0:Hd]
        f_g = sig[:, Hd:2 * Hd]
        g_g = th[:, 2 * Hd:3 * Hd]
        o_g = sig[:, 3 * Hd:4 * Hd]
        c_t = f_g * c_t + i_g * g_g
        h_t = o_g * jnp.tanh(c_t)

    # ------------------------------------------------------------------ step 3
    # language_scores on the last hidden state + log_softmax, fused.
    scores = (jnp.dot(h_t, wls_ref[...], preferred_element_type=jnp.float32)
              + bls_ref[...])
    m = jnp.max(scores, axis=1, keepdims=True)
    lse = m + jnp.log(jnp.sum(jnp.exp(scores - m), axis=1, keepdims=True))
    out_ref[...] = (scores - lse).astype(out_ref.dtype)


# ------------------------------- full forward ---------------------------------
def convlstm_forward(x, p):
    B, C, Hh, W = x.shape
    O, Ci, KH, KW = p["conv_w"].shape
    assert Ci == C and O == 1 and KH == 1 and KW % 2 == 1
    F = O * Hh                 # LSTM feature dim (= out_channels * n_features)
    T = W                      # LSTM sequence length (= total_frames)
    assert W % F == 0          # each timestep = F contiguous elems of one conv row
    n_chunk = W // F
    pad = KW // 2
    H4 = p["w_ih"].shape[0]
    Hd = H4 // 4
    L = p["w_ls"].shape[0]

    # ---- host-side weight folding: conv (x) view-chunking (x) W_ih^T ----
    # zin[b, t=hr*n_chunk+s, col] = sum_{c,w'} x[b,c,hr,w'] * A[c*W+w', s*H4+col]
    # with A[c,w',s,col] = sum_{f,k : s*F+f+k-pad == w'} conv_w[c,k] * W_ih^T[f,col]
    # (out-of-range taps are the conv's zero padding -> simply absent from A).
    wih_t = p["w_ih"].T                                     # (F, 4H)
    cw = p["conv_w"].reshape(C, KW)                         # (C, KW)
    sel = np.zeros((n_chunk, F, KW, W), np.float32)         # one-hot tap->lane map
    for s in range(n_chunk):
        for f in range(F):
            for k in range(KW):
                wp = s * F + f + k - pad
                if 0 <= wp < W:
                    sel[s, f, k, wp] = 1.0
    A = jnp.einsum("sfkw,ck,fg->cwsg", jnp.asarray(sel), cw, wih_t,
                   precision=jax.lax.Precision.HIGHEST)
    A = A.reshape(C * W, n_chunk * H4)

    # folded bias: LSTM biases + conv bias pushed through the input projection,
    # pre-tiled over the n_chunk lane blocks so the kernel adds it once.
    b_zin = (p["b_ih"] + p["b_hh"]) + p["conv_b"][0] * jnp.sum(wih_t, axis=0)
    bz_tiled = jnp.tile(b_zin.reshape(1, H4), (1, n_chunk))  # (1, n_chunk*4H)

    # layout plumbing (wrapper-side, not compute): rows (h_row, batch),
    # lanes (channel, w) -> matmul-ready (Hh*B, C*W) slab.
    x_flat = jnp.transpose(x, (2, 0, 1, 3)).reshape(Hh * B, C * W)

    kern = functools.partial(convlstm_fused_kernel, B=B, Hd=Hd, H4=H4, T=T,
                             n_chunk=n_chunk)
    vmem = pl.BlockSpec(memory_space=pltpu.MemorySpace.VMEM)

    return pl.pallas_call(
        kern,
        out_shape=jax.ShapeDtypeStruct((B, L), jnp.float32),
        in_specs=[vmem] * 6,
        out_specs=vmem,
    )(x_flat,                        # (Hh*B, C*W)
      A,                             # (C*W, n_chunk*4H)
      bz_tiled,                      # (1, n_chunk*4H)
      p["w_hh"].T,                   # (Hd, 4H)
      p["w_ls"].T,                   # (Hd, L)
      p["b_ls"].reshape(1, L))       # (1, L)


# -------------------------- deterministic parameters --------------------------
def init_params(key):
    ks = jax.random.split(key, 8)
    KH, KW = KERNEL
    H4 = 4 * N_HIDDEN
    F = N_FEATURES * OUT_CHANNELS

    def u(k, shape, scale=0.2):
        return jax.random.uniform(k, shape, jnp.float32, -scale, scale)

    return {
        "conv_w": u(ks[0], (OUT_CHANNELS, IN_CHANNELS, KH, KW)),
        "conv_b": u(ks[1], (OUT_CHANNELS,)),
        "w_ih": u(ks[2], (H4, F)),          # nn.LSTM weight_ih_l0
        "w_hh": u(ks[3], (H4, N_HIDDEN)),   # nn.LSTM weight_hh_l0
        "b_ih": u(ks[4], (H4,)),
        "b_hh": u(ks[5], (H4,)),
        "w_ls": u(ks[6], (N_LANGUAGES, N_HIDDEN)),   # language_scores Linear
        "b_ls": u(ks[7], (N_LANGUAGES,)),
    }


# ------------------------------ pure-JAX reference -----------------------------
def reference_forward(x, p):
    out = jax.lax.conv_general_dilated(
        x, p["conv_w"], (1, 1),
        ((KERNEL[0] // 2, KERNEL[0] // 2), (KERNEL[1] // 2, KERNEL[1] // 2)),
        dimension_numbers=("NCHW", "OIHW", "NCHW"),
        precision=jax.lax.Precision.HIGHEST)
    out = out + p["conv_b"].reshape(1, -1, 1, 1)
    B, C, H, W = out.shape
    # exact analogue of torch `out.view([B, W, C*H])` on contiguous NCHW memory
    seq = out.reshape(B, W, C * H)
    Hd = N_HIDDEN
    wih_t, whh_t = p["w_ih"].T, p["w_hh"].T
    b = p["b_ih"] + p["b_hh"]

    def step(carry, x_t):
        h, c = carry
        z = (jnp.dot(x_t, wih_t, precision=jax.lax.Precision.HIGHEST)
             + jnp.dot(h, whh_t, precision=jax.lax.Precision.HIGHEST) + b)
        i = jax.nn.sigmoid(z[:, :Hd])
        f = jax.nn.sigmoid(z[:, Hd:2 * Hd])
        g = jnp.tanh(z[:, 2 * Hd:3 * Hd])
        o = jax.nn.sigmoid(z[:, 3 * Hd:])
        c = f * c + i * g
        h = o * jnp.tanh(c)
        return (h, c), None

    h0 = jnp.zeros((B, Hd), jnp.float32)
    (h, _), _ = jax.lax.scan(step, (h0, h0), jnp.transpose(seq, (1, 0, 2)))
    scores = jnp.dot(h, p["w_ls"].T, precision=jax.lax.Precision.HIGHEST) + p["b_ls"]
    return jax.nn.log_softmax(scores, axis=1)


if __name__ == "__main__":
    key = jax.random.PRNGKey(0)
    kp, kx = jax.random.split(key)
    params = init_params(kp)
    x = jax.random.normal(kx, (BATCH, IN_CHANNELS, N_FEATURES, TOTAL_FRAMES),
                          jnp.float32)

    out = convlstm_forward(x, params)
    out = jax.block_until_ready(out)

    ref = reference_forward(x, params)
    assert out.shape == (BATCH, N_LANGUAGES)
    # in-kernel dots use default MXU precision vs. HIGHEST in the reference;
    # 3e-3 leaves margin for that while still validating the full forward pass.
    assert jnp.allclose(out, ref, atol=3e-3, rtol=3e-3), (out, ref)
    print("KERNEL_OK")
</pallas_src>

<mosaic_0001>
module attributes {stable_mosaic.version = 11 : i64} {
  func.func @convlstm_fused_kernel(%arg0: memref<16x48xf32, #tpu.memory_space<vmem>>, %arg1: memref<48x256xf32, #tpu.memory_space<vmem>>, %arg2: memref<1x256xf32, #tpu.memory_space<vmem>>, %arg3: memref<32x128xf32, #tpu.memory_space<vmem>>, %arg4: memref<32x2xf32, #tpu.memory_space<vmem>>, %arg5: memref<1x2xf32, #tpu.memory_space<vmem>>, %arg6: memref<2x2xf32, #tpu.memory_space<vmem>>) attributes {dimension_semantics = [], scalar_prefetch = 0 : i64, scratch_operands = 0 : i64, tpu.core_type = #tpu.core_type<tc>} {
    %c0 = arith.constant 0 : index
    %c0_0 = arith.constant 0 : index
    %0 = vector.load %arg0[%c0, %c0_0] : memref<16x48xf32, #tpu.memory_space<vmem>>, vector<16x48xf32>
    %c0_1 = arith.constant 0 : index
    %c0_2 = arith.constant 0 : index
    %1 = vector.load %arg1[%c0_1, %c0_2] : memref<48x256xf32, #tpu.memory_space<vmem>>, vector<48x256xf32>
    %cst = arith.constant dense<0.000000e+00> : vector<16x256xf32>
    %2 = tpu.matmul %0, %1, %cst {dimension_numbers = #tpu.dot_dimension_numbers<[1], [0], [0], [1], [0, 0, 1, 1], [], []>} : vector<16x48xf32>, vector<48x256xf32>, vector<16x256xf32> -> vector<16x256xf32>
    %c0_3 = arith.constant 0 : index
    %c0_4 = arith.constant 0 : index
    %3 = vector.load %arg2[%c0_3, %c0_4] : memref<1x256xf32, #tpu.memory_space<vmem>>, vector<1x256xf32>
    %4 = vector.broadcast %3 : vector<1x256xf32> to vector<16x256xf32>
    %5 = arith.addf %2, %4 : vector<16x256xf32>
    %c0_5 = arith.constant 0 : index
    %c0_6 = arith.constant 0 : index
    %6 = vector.load %arg3[%c0_5, %c0_6] : memref<32x128xf32, #tpu.memory_space<vmem>>, vector<32x128xf32>
    %cst_7 = arith.constant 0.000000e+00 : f32
    %7 = vector.broadcast %cst_7 : f32 to vector<2x32xf32>
    %cst_8 = arith.constant 0.000000e+00 : f32
    %8 = vector.broadcast %cst_8 : f32 to vector<2x32xf32>
    %9 = vector.extract_strided_slice %5 {offsets = [0, 0], sizes = [2, 128], strides = [1, 1]} : vector<16x256xf32> to vector<2x128xf32>
    %cst_9 = arith.constant dense<0.000000e+00> : vector<2x128xf32>
    %10 = tpu.matmul %7, %6, %cst_9 {dimension_numbers = #tpu.dot_dimension_numbers<[1], [0], [0], [1], [0, 0, 1, 1], [], []>} : vector<2x32xf32>, vector<32x128xf32>, vector<2x128xf32> -> vector<2x128xf32>
    %11 = arith.addf %9, %10 : vector<2x128xf32>
    %12 = arith.negf %11 : vector<2x128xf32>
    %13 = math.exp %12 : vector<2x128xf32>
    %cst_10 = arith.constant 1.000000e+00 : f32
    %14 = vector.broadcast %cst_10 : f32 to vector<2x128xf32>
    %15 = arith.addf %14, %13 : vector<2x128xf32>
    %16 = arith.divf %14, %15 : vector<2x128xf32>
    %17 = math.tanh %11 : vector<2x128xf32>
    %18 = vector.extract_strided_slice %16 {offsets = [0, 0], sizes = [2, 32], strides = [1, 1]} : vector<2x128xf32> to vector<2x32xf32>
    %19 = vector.extract_strided_slice %16 {offsets = [0, 32], sizes = [2, 32], strides = [1, 1]} : vector<2x128xf32> to vector<2x32xf32>
    %20 = vector.extract_strided_slice %17 {offsets = [0, 64], sizes = [2, 32], strides = [1, 1]} : vector<2x128xf32> to vector<2x32xf32>
    %21 = vector.extract_strided_slice %16 {offsets = [0, 96], sizes = [2, 32], strides = [1, 1]} : vector<2x128xf32> to vector<2x32xf32>
    %22 = arith.mulf %19, %8 : vector<2x32xf32>
    %23 = arith.mulf %18, %20 : vector<2x32xf32>
    %24 = arith.addf %22, %23 : vector<2x32xf32>
    %25 = math.tanh %24 : vector<2x32xf32>
    %26 = arith.mulf %21, %25 : vector<2x32xf32>
    %27 = vector.extract_strided_slice %5 {offsets = [0, 128], sizes = [2, 128], strides = [1, 1]} : vector<16x256xf32> to vector<2x128xf32>
    %cst_11 = arith.constant dense<0.000000e+00> : vector<2x128xf32>
    %28 = tpu.matmul %26, %6, %cst_11 {dimension_numbers = #tpu.dot_dimension_numbers<[1], [0], [0], [1], [0, 0, 1, 1], [], []>} : vector<2x32xf32>, vector<32x128xf32>, vector<2x128xf32> -> vector<2x128xf32>
    %29 = arith.addf %27, %28 : vector<2x128xf32>
    %30 = arith.negf %29 : vector<2x128xf32>
    %31 = math.exp %30 : vector<2x128xf32>
    %cst_12 = arith.constant 1.000000e+00 : f32
    %32 = vector.broadcast %cst_12 : f32 to vector<2x128xf32>
    %33 = arith.addf %32, %31 : vector<2x128xf32>
    %34 = arith.divf %32, %33 : vector<2x128xf32>
    %35 = math.tanh %29 : vector<2x128xf32>
    %36 = vector.extract_strided_slice %34 {offsets = [0, 0], sizes = [2, 32], strides = [1, 1]} : vector<2x128xf32> to vector<2x32xf32>
    %37 = vector.extract_strided_slice %34 {offsets = [0, 32], sizes = [2, 32], strides = [1, 1]} : vector<2x128xf32> to vector<2x32xf32>
    %38 = vector.extract_strided_slice %35 {offsets = [0, 64], sizes = [2, 32], strides = [1, 1]} : vector<2x128xf32> to vector<2x32xf32>
    %39 = vector.extract_strided_slice %34 {offsets = [0, 96], sizes = [2, 32], strides = [1, 1]} : vector<2x128xf32> to vector<2x32xf32>
    %40 = arith.mulf %37, %24 : vector<2x32xf32>
    %41 = arith.mulf %36, %38 : vector<2x32xf32>
    %42 = arith.addf %40, %41 : vector<2x32xf32>
    %43 = math.tanh %42 : vector<2x32xf32>
    %44 = arith.mulf %39, %43 : vector<2x32xf32>
    %45 = vector.extract_strided_slice %5 {offsets = [2, 0], sizes = [2, 128], strides = [1, 1]} : vector<16x256xf32> to vector<2x128xf32>
    %cst_13 = arith.constant dense<0.000000e+00> : vector<2x128xf32>
    %46 = tpu.matmul %44, %6, %cst_13 {dimension_numbers = #tpu.dot_dimension_numbers<[1], [0], [0], [1], [0, 0, 1, 1], [], []>} : vector<2x32xf32>, vector<32x128xf32>, vector<2x128xf32> -> vector<2x128xf32>
    %47 = arith.addf %45, %46 : vector<2x128xf32>
    %48 = arith.negf %47 : vector<2x128xf32>
    %49 = math.exp %48 : vector<2x128xf32>
    %cst_14 = arith.constant 1.000000e+00 : f32
    %50 = vector.broadcast %cst_14 : f32 to vector<2x128xf32>
    %51 = arith.addf %50, %49 : vector<2x128xf32>
    %52 = arith.divf %50, %51 : vector<2x128xf32>
    %53 = math.tanh %47 : vector<2x128xf32>
    %54 = vector.extract_strided_slice %52 {offsets = [0, 0], sizes = [2, 32], strides = [1, 1]} : vector<2x128xf32> to vector<2x32xf32>
    %55 = vector.extract_strided_slice %52 {offsets = [0, 32], sizes = [2, 32], strides = [1, 1]} : vector<2x128xf32> to vector<2x32xf32>
    %56 = vector.extract_strided_slice %53 {offsets = [0, 64], sizes = [2, 32], strides = [1, 1]} : vector<2x128xf32> to vector<2x32xf32>
    %57 = vector.extract_strided_slice %52 {offsets = [0, 96], sizes = [2, 32], strides = [1, 1]} : vector<2x128xf32> to vector<2x32xf32>
    %58 = arith.mulf %55, %42 : vector<2x32xf32>
    %59 = arith.mulf %54, %56 : vector<2x32xf32>
    %60 = arith.addf %58, %59 : vector<2x32xf32>
    %61 = math.tanh %60 : vector<2x32xf32>
    %62 = arith.mulf %57, %61 : vector<2x32xf32>
    %63 = vector.extract_strided_slice %5 {offsets = [2, 128], sizes = [2, 128], strides = [1, 1]} : vector<16x256xf32> to vector<2x128xf32>
    %cst_15 = arith.constant dense<0.000000e+00> : vector<2x128xf32>
    %64 = tpu.matmul %62, %6, %cst_15 {dimension_numbers = #tpu.dot_dimension_numbers<[1], [0], [0], [1], [0, 0, 1, 1], [], []>} : vector<2x32xf32>, vector<32x128xf32>, vector<2x128xf32> -> vector<2x128xf32>
    %65 = arith.addf %63, %64 : vector<2x128xf32>
    %66 = arith.negf %65 : vector<2x128xf32>
    %67 = math.exp %66 : vector<2x128xf32>
    %cst_16 = arith.constant 1.000000e+00 : f32
    %68 = vector.broadcast %cst_16 : f32 to vector<2x128xf32>
    %69 = arith.addf %68, %67 : vector<2x128xf32>
    %70 = arith.divf %68, %69 : vector<2x128xf32>
    %71 = math.tanh %65 : vector<2x128xf32>
    %72 = vector.extract_strided_slice %70 {offsets = [0, 0], sizes = [2, 32], strides = [1, 1]} : vector<2x128xf32> to vector<2x32xf32>
    %73 = vector.extract_strided_slice %70 {offsets = [0, 32], sizes = [2, 32], strides = [1, 1]} : vector<2x128xf32> to vector<2x32xf32>
    %74 = vector.extract_strided_slice %71 {offsets = [0, 64], sizes = [2, 32], strides = [1, 1]} : vector<2x128xf32> to vector<2x32xf32>
    %75 = vector.extract_strided_slice %70 {offsets = [0, 96], sizes = [2, 32], strides = [1, 1]} : vector<2x128xf32> to vector<2x32xf32>
    %76 = arith.mulf %73, %60 : vector<2x32xf32>
    %77 = arith.mulf %72, %74 : vector<2x32xf32>
    %78 = arith.addf %76, %77 : vector<2x32xf32>
    %79 = math.tanh %78 : vector<2x32xf32>
    %80 = arith.mulf %75, %79 : vector<2x32xf32>
    %81 = vector.extract_strided_slice %5 {offsets = [4, 0], sizes = [2, 128], strides = [1, 1]} : vector<16x256xf32> to vector<2x128xf32>
    %cst_17 = arith.constant dense<0.000000e+00> : vector<2x128xf32>
    %82 = tpu.matmul %80, %6, %cst_17 {dimension_numbers = #tpu.dot_dimension_numbers<[1], [0], [0], [1], [0, 0, 1, 1], [], []>} : vector<2x32xf32>, vector<32x128xf32>, vector<2x128xf32> -> vector<2x128xf32>
    %83 = arith.addf %81, %82 : vector<2x128xf32>
    %84 = arith.negf %83 : vector<2x128xf32>
    %85 = math.exp %84 : vector<2x128xf32>
    %cst_18 = arith.constant 1.000000e+00 : f32
    %86 = vector.broadcast %cst_18 : f32 to vector<2x128xf32>
    %87 = arith.addf %86, %85 : vector<2x128xf32>
    %88 = arith.divf %86, %87 : vector<2x128xf32>
    %89 = math.tanh %83 : vector<2x128xf32>
    %90 = vector.extract_strided_slice %88 {offsets = [0, 0], sizes = [2, 32], strides = [1, 1]} : vector<2x128xf32> to vector<2x32xf32>
    %91 = vector.extract_strided_slice %88 {offsets = [0, 32], sizes = [2, 32], strides = [1, 1]} : vector<2x128xf32> to vector<2x32xf32>
    %92 = vector.extract_strided_slice %89 {offsets = [0, 64], sizes = [2, 32], strides = [1, 1]} : vector<2x128xf32> to vector<2x32xf32>
    %93 = vector.extract_strided_slice %88 {offsets = [0, 96], sizes = [2, 32], strides = [1, 1]} : vector<2x128xf32> to vector<2x32xf32>
    %94 = arith.mulf %91, %78 : vector<2x32xf32>
    %95 = arith.mulf %90, %92 : vector<2x32xf32>
    %96 = arith.addf %94, %95 : vector<2x32xf32>
    %97 = math.tanh %96 : vector<2x32xf32>
    %98 = arith.mulf %93, %97 : vector<2x32xf32>
    %99 = vector.extract_strided_slice %5 {offsets = [4, 128], sizes = [2, 128], strides = [1, 1]} : vector<16x256xf32> to vector<2x128xf32>
    %cst_19 = arith.constant dense<0.000000e+00> : vector<2x128xf32>
    %100 = tpu.matmul %98, %6, %cst_19 {dimension_numbers = #tpu.dot_dimension_numbers<[1], [0], [0], [1], [0, 0, 1, 1], [], []>} : vector<2x32xf32>, vector<32x128xf32>, vector<2x128xf32> -> vector<2x128xf32>
    %101 = arith.addf %99, %100 : vector<2x128xf32>
    %102 = arith.negf %101 : vector<2x128xf32>
    %103 = math.exp %102 : vector<2x128xf32>
    %cst_20 = arith.constant 1.000000e+00 : f32
    %104 = vector.broadcast %cst_20 : f32 to vector<2x128xf32>
    %105 = arith.addf %104, %103 : vector<2x128xf32>
    %106 = arith.divf %104, %105 : vector<2x128xf32>
    %107 = math.tanh %101 : vector<2x128xf32>
    %108 = vector.extract_strided_slice %106 {offsets = [0, 0], sizes = [2, 32], strides = [1, 1]} : vector<2x128xf32> to vector<2x32xf32>
    %109 = vector.extract_strided_slice %106 {offsets = [0, 32], sizes = [2, 32], strides = [1, 1]} : vector<2x128xf32> to vector<2x32xf32>
    %110 = vector.extract_strided_slice %107 {offsets = [0, 64], sizes = [2, 32], strides = [1, 1]} : vector<2x128xf32> to vector<2x32xf32>
    %111 = vector.extract_strided_slice %106 {offsets = [0, 96], sizes = [2, 32], strides = [1, 1]} : vector<2x128xf32> to vector<2x32xf32>
    %112 = arith.mulf %109, %96 : vector<2x32xf32>
    %113 = arith.mulf %108, %110 : vector<2x32xf32>
    %114 = arith.addf %112, %113 : vector<2x32xf32>
    %115 = math.tanh %114 : vector<2x32xf32>
    %116 = arith.mulf %111, %115 : vector<2x32xf32>
    %117 = vector.extract_strided_slice %5 {offsets = [6, 0], sizes = [2, 128], strides = [1, 1]} : vector<16x256xf32> to vector<2x128xf32>
    %cst_21 = arith.constant dense<0.000000e+00> : vector<2x128xf32>
    %118 = tpu.matmul %116, %6, %cst_21 {dimension_numbers = #tpu.dot_dimension_numbers<[1], [0], [0], [1], [0, 0, 1, 1], [], []>} : vector<2x32xf32>, vector<32x128xf32>, vector<2x128xf32> -> vector<2x128xf32>
    %119 = arith.addf %117, %118 : vector<2x128xf32>
    %120 = arith.negf %119 : vector<2x128xf32>
    %121 = math.exp %120 : vector<2x128xf32>
    %cst_22 = arith.constant 1.000000e+00 : f32
    %122 = vector.broadcast %cst_22 : f32 to vector<2x128xf32>
    %123 = arith.addf %122, %121 : vector<2x128xf32>
    %124 = arith.divf %122, %123 : vector<2x128xf32>
    %125 = math.tanh %119 : vector<2x128xf32>
    %126 = vector.extract_strided_slice %124 {offsets = [0, 0], sizes = [2, 32], strides = [1, 1]} : vector<2x128xf32> to vector<2x32xf32>
    %127 = vector.extract_strided_slice %124 {offsets = [0, 32], sizes = [2, 32], strides = [1, 1]} : vector<2x128xf32> to vector<2x32xf32>
    %128 = vector.extract_strided_slice %125 {offsets = [0, 64], sizes = [2, 32], strides = [1, 1]} : vector<2x128xf32> to vector<2x32xf32>
    %129 = vector.extract_strided_slice %124 {offsets = [0, 96], sizes = [2, 32], strides = [1, 1]} : vector<2x128xf32> to vector<2x32xf32>
    %130 = arith.mulf %127, %114 : vector<2x32xf32>
    %131 = arith.mulf %126, %128 : vector<2x32xf32>
    %132 = arith.addf %130, %131 : vector<2x32xf32>
    %133 = math.tanh %132 : vector<2x32xf32>
    %134 = arith.mulf %129, %133 : vector<2x32xf32>
    %135 = vector.extract_strided_slice %5 {offsets = [6, 128], sizes = [2, 128], strides = [1, 1]} : vector<16x256xf32> to vector<2x128xf32>
    %cst_23 = arith.constant dense<0.000000e+00> : vector<2x128xf32>
    %136 = tpu.matmul %134, %6, %cst_23 {dimension_numbers = #tpu.dot_dimension_numbers<[1], [0], [0], [1], [0, 0, 1, 1], [], []>} : vector<2x32xf32>, vector<32x128xf32>, vector<2x128xf32> -> vector<2x128xf32>
    %137 = arith.addf %135, %136 : vector<2x128xf32>
    %138 = arith.negf %137 : vector<2x128xf32>
    %139 = math.exp %138 : vector<2x128xf32>
    %cst_24 = arith.constant 1.000000e+00 : f32
    %140 = vector.broadcast %cst_24 : f32 to vector<2x128xf32>
    %141 = arith.addf %140, %139 : vector<2x128xf32>
    %142 = arith.divf %140, %141 : vector<2x128xf32>
    %143 = math.tanh %137 : vector<2x128xf32>
    %144 = vector.extract_strided_slice %142 {offsets = [0, 0], sizes = [2, 32], strides = [1, 1]} : vector<2x128xf32> to vector<2x32xf32>
    %145 = vector.extract_strided_slice %142 {offsets = [0, 32], sizes = [2, 32], strides = [1, 1]} : vector<2x128xf32> to vector<2x32xf32>
    %146 = vector.extract_strided_slice %143 {offsets = [0, 64], sizes = [2, 32], strides = [1, 1]} : vector<2x128xf32> to vector<2x32xf32>
    %147 = vector.extract_strided_slice %142 {offsets = [0, 96], sizes = [2, 32], strides = [1, 1]} : vector<2x128xf32> to vector<2x32xf32>
    %148 = arith.mulf %145, %132 : vector<2x32xf32>
    %149 = arith.mulf %144, %146 : vector<2x32xf32>
    %150 = arith.addf %148, %149 : vector<2x32xf32>
    %151 = math.tanh %150 : vector<2x32xf32>
    %152 = arith.mulf %147, %151 : vector<2x32xf32>
    %153 = vector.extract_strided_slice %5 {offsets = [8, 0], sizes = [2, 128], strides = [1, 1]} : vector<16x256xf32> to vector<2x128xf32>
    %cst_25 = arith.constant dense<0.000000e+00> : vector<2x128xf32>
    %154 = tpu.matmul %152, %6, %cst_25 {dimension_numbers = #tpu.dot_dimension_numbers<[1], [0], [0], [1], [0, 0, 1, 1], [], []>} : vector<2x32xf32>, vector<32x128xf32>, vector<2x128xf32> -> vector<2x128xf32>
    %155 = arith.addf %153, %154 : vector<2x128xf32>
    %156 = arith.negf %155 : vector<2x128xf32>
    %157 = math.exp %156 : vector<2x128xf32>
    %cst_26 = arith.constant 1.000000e+00 : f32
    %158 = vector.broadcast %cst_26 : f32 to vector<2x128xf32>
    %159 = arith.addf %158, %157 : vector<2x128xf32>
    %160 = arith.divf %158, %159 : vector<2x128xf32>
    %161 = math.tanh %155 : vector<2x128xf32>
    %162 = vector.extract_strided_slice %160 {offsets = [0, 0], sizes = [2, 32], strides = [1, 1]} : vector<2x128xf32> to vector<2x32xf32>
    %163 = vector.extract_strided_slice %160 {offsets = [0, 32], sizes = [2, 32], strides = [1, 1]} : vector<2x128xf32> to vector<2x32xf32>
    %164 = vector.extract_strided_slice %161 {offsets = [0, 64], sizes = [2, 32], strides = [1, 1]} : vector<2x128xf32> to vector<2x32xf32>
    %165 = vector.extract_strided_slice %160 {offsets = [0, 96], sizes = [2, 32], strides = [1, 1]} : vector<2x128xf32> to vector<2x32xf32>
    %166 = arith.mulf %163, %150 : vector<2x32xf32>
    %167 = arith.mulf %162, %164 : vector<2x32xf32>
    %168 = arith.addf %166, %167 : vector<2x32xf32>
    %169 = math.tanh %168 : vector<2x32xf32>
    %170 = arith.mulf %165, %169 : vector<2x32xf32>
    %171 = vector.extract_strided_slice %5 {offsets = [8, 128], sizes = [2, 128], strides = [1, 1]} : vector<16x256xf32> to vector<2x128xf32>
    %cst_27 = arith.constant dense<0.000000e+00> : vector<2x128xf32>
    %172 = tpu.matmul %170, %6, %cst_27 {dimension_numbers = #tpu.dot_dimension_numbers<[1], [0], [0], [1], [0, 0, 1, 1], [], []>} : vector<2x32xf32>, vector<32x128xf32>, vector<2x128xf32> -> vector<2x128xf32>
    %173 = arith.addf %171, %172 : vector<2x128xf32>
    %174 = arith.negf %173 : vector<2x128xf32>
    %175 = math.exp %174 : vector<2x128xf32>
    %cst_28 = arith.constant 1.000000e+00 : f32
    %176 = vector.broadcast %cst_28 : f32 to vector<2x128xf32>
    %177 = arith.addf %176, %175 : vector<2x128xf32>
    %178 = arith.divf %176, %177 : vector<2x128xf32>
    %179 = math.tanh %173 : vector<2x128xf32>
    %180 = vector.extract_strided_slice %178 {offsets = [0, 0], sizes = [2, 32], strides = [1, 1]} : vector<2x128xf32> to vector<2x32xf32>
    %181 = vector.extract_strided_slice %178 {offsets = [0, 32], sizes = [2, 32], strides = [1, 1]} : vector<2x128xf32> to vector<2x32xf32>
    %182 = vector.extract_strided_slice %179 {offsets = [0, 64], sizes = [2, 32], strides = [1, 1]} : vector<2x128xf32> to vector<2x32xf32>
    %183 = vector.extract_strided_slice %178 {offsets = [0, 96], sizes = [2, 32], strides = [1, 1]} : vector<2x128xf32> to vector<2x32xf32>
    %184 = arith.mulf %181, %168 : vector<2x32xf32>
    %185 = arith.mulf %180, %182 : vector<2x32xf32>
    %186 = arith.addf %184, %185 : vector<2x32xf32>
    %187 = math.tanh %186 : vector<2x32xf32>
    %188 = arith.mulf %183, %187 : vector<2x32xf32>
    %189 = vector.extract_strided_slice %5 {offsets = [10, 0], sizes = [2, 128], strides = [1, 1]} : vector<16x256xf32> to vector<2x128xf32>
    %cst_29 = arith.constant dense<0.000000e+00> : vector<2x128xf32>
    %190 = tpu.matmul %188, %6, %cst_29 {dimension_numbers = #tpu.dot_dimension_numbers<[1], [0], [0], [1], [0, 0, 1, 1], [], []>} : vector<2x32xf32>, vector<32x128xf32>, vector<2x128xf32> -> vector<2x128xf32>
    %191 = arith.addf %189, %190 : vector<2x128xf32>
    %192 = arith.negf %191 : vector<2x128xf32>
    %193 = math.exp %192 : vector<2x128xf32>
    %cst_30 = arith.constant 1.000000e+00 : f32
    %194 = vector.broadcast %cst_30 : f32 to vector<2x128xf32>
    %195 = arith.addf %194, %193 : vector<2x128xf32>
    %196 = arith.divf %194, %195 : vector<2x128xf32>
    %197 = math.tanh %191 : vector<2x128xf32>
    %198 = vector.extract_strided_slice %196 {offsets = [0, 0], sizes = [2, 32], strides = [1, 1]} : vector<2x128xf32> to vector<2x32xf32>
    %199 = vector.extract_strided_slice %196 {offsets = [0, 32], sizes = [2, 32], strides = [1, 1]} : vector<2x128xf32> to vector<2x32xf32>
    %200 = vector.extract_strided_slice %197 {offsets = [0, 64], sizes = [2, 32], strides = [1, 1]} : vector<2x128xf32> to vector<2x32xf32>
    %201 = vector.extract_strided_slice %196 {offsets = [0, 96], sizes = [2, 32], strides = [1, 1]} : vector<2x128xf32> to vector<2x32xf32>
    %202 = arith.mulf %199, %186 : vector<2x32xf32>
    %203 = arith.mulf %198, %200 : vector<2x32xf32>
    %204 = arith.addf %202, %203 : vector<2x32xf32>
    %205 = math.tanh %204 : vector<2x32xf32>
    %206 = arith.mulf %201, %205 : vector<2x32xf32>
    %207 = vector.extract_strided_slice %5 {offsets = [10, 128], sizes = [2, 128], strides = [1, 1]} : vector<16x256xf32> to vector<2x128xf32>
    %cst_31 = arith.constant dense<0.000000e+00> : vector<2x128xf32>
    %208 = tpu.matmul %206, %6, %cst_31 {dimension_numbers = #tpu.dot_dimension_numbers<[1], [0], [0], [1], [0, 0, 1, 1], [], []>} : vector<2x32xf32>, vector<32x128xf32>, vector<2x128xf32> -> vector<2x128xf32>
    %209 = arith.addf %207, %208 : vector<2x128xf32>
    %210 = arith.negf %209 : vector<2x128xf32>
    %211 = math.exp %210 : vector<2x128xf32>
    %cst_32 = arith.constant 1.000000e+00 : f32
    %212 = vector.broadcast %cst_32 : f32 to vector<2x128xf32>
    %213 = arith.addf %212, %211 : vector<2x128xf32>
    %214 = arith.divf %212, %213 : vector<2x128xf32>
    %215 = math.tanh %209 : vector<2x128xf32>
    %216 = vector.extract_strided_slice %214 {offsets = [0, 0], sizes = [2, 32], strides = [1, 1]} : vector<2x128xf32> to vector<2x32xf32>
    %217 = vector.extract_strided_slice %214 {offsets = [0, 32], sizes = [2, 32], strides = [1, 1]} : vector<2x128xf32> to vector<2x32xf32>
    %218 = vector.extract_strided_slice %215 {offsets = [0, 64], sizes = [2, 32], strides = [1, 1]} : vector<2x128xf32> to vector<2x32xf32>
    %219 = vector.extract_strided_slice %214 {offsets = [0, 96], sizes = [2, 32], strides = [1, 1]} : vector<2x128xf32> to vector<2x32xf32>
    %220 = arith.mulf %217, %204 : vector<2x32xf32>
    %221 = arith.mulf %216, %218 : vector<2x32xf32>
    %222 = arith.addf %220, %221 : vector<2x32xf32>
    %223 = math.tanh %222 : vector<2x32xf32>
    %224 = arith.mulf %219, %223 : vector<2x32xf32>
    %225 = vector.extract_strided_slice %5 {offsets = [12, 0], sizes = [2, 128], strides = [1, 1]} : vector<16x256xf32> to vector<2x128xf32>
    %cst_33 = arith.constant dense<0.000000e+00> : vector<2x128xf32>
    %226 = tpu.matmul %224, %6, %cst_33 {dimension_numbers = #tpu.dot_dimension_numbers<[1], [0], [0], [1], [0, 0, 1, 1], [], []>} : vector<2x32xf32>, vector<32x128xf32>, vector<2x128xf32> -> vector<2x128xf32>
    %227 = arith.addf %225, %226 : vector<2x128xf32>
    %228 = arith.negf %227 : vector<2x128xf32>
    %229 = math.exp %228 : vector<2x128xf32>
    %cst_34 = arith.constant 1.000000e+00 : f32
    %230 = vector.broadcast %cst_34 : f32 to vector<2x128xf32>
    %231 = arith.addf %230, %229 : vector<2x128xf32>
    %232 = arith.divf %230, %231 : vector<2x128xf32>
    %233 = math.tanh %227 : vector<2x128xf32>
    %234 = vector.extract_strided_slice %232 {offsets = [0, 0], sizes = [2, 32], strides = [1, 1]} : vector<2x128xf32> to vector<2x32xf32>
    %235 = vector.extract_strided_slice %232 {offsets = [0, 32], sizes = [2, 32], strides = [1, 1]} : vector<2x128xf32> to vector<2x32xf32>
    %236 = vector.extract_strided_slice %233 {offsets = [0, 64], sizes = [2, 32], strides = [1, 1]} : vector<2x128xf32> to vector<2x32xf32>
    %237 = vector.extract_strided_slice %232 {offsets = [0, 96], sizes = [2, 32], strides = [1, 1]} : vector<2x128xf32> to vector<2x32xf32>
    %238 = arith.mulf %235, %222 : vector<2x32xf32>
    %239 = arith.mulf %234, %236 : vector<2x32xf32>
    %240 = arith.addf %238, %239 : vector<2x32xf32>
    %241 = math.tanh %240 : vector<2x32xf32>
    %242 = arith.mulf %237, %241 : vector<2x32xf32>
    %243 = vector.extract_strided_slice %5 {offsets = [12, 128], sizes = [2, 128], strides = [1, 1]} : vector<16x256xf32> to vector<2x128xf32>
    %cst_35 = arith.constant dense<0.000000e+00> : vector<2x128xf32>
    %244 = tpu.matmul %242, %6, %cst_35 {dimension_numbers = #tpu.dot_dimension_numbers<[1], [0], [0], [1], [0, 0, 1, 1], [], []>} : vector<2x32xf32>, vector<32x128xf32>, vector<2x128xf32> -> vector<2x128xf32>
    %245 = arith.addf %243, %244 : vector<2x128xf32>
    %246 = arith.negf %245 : vector<2x128xf32>
    %247 = math.exp %246 : vector<2x128xf32>
    %cst_36 = arith.constant 1.000000e+00 : f32
    %248 = vector.broadcast %cst_36 : f32 to vector<2x128xf32>
    %249 = arith.addf %248, %247 : vector<2x128xf32>
    %250 = arith.divf %248, %249 : vector<2x128xf32>
    %251 = math.tanh %245 : vector<2x128xf32>
    %252 = vector.extract_strided_slice %250 {offsets = [0, 0], sizes = [2, 32], strides = [1, 1]} : vector<2x128xf32> to vector<2x32xf32>
    %253 = vector.extract_strided_slice %250 {offsets = [0, 32], sizes = [2, 32], strides = [1, 1]} : vector<2x128xf32> to vector<2x32xf32>
    %254 = vector.extract_strided_slice %251 {offsets = [0, 64], sizes = [2, 32], strides = [1, 1]} : vector<2x128xf32> to vector<2x32xf32>
    %255 = vector.extract_strided_slice %250 {offsets = [0, 96], sizes = [2, 32], strides = [1, 1]} : vector<2x128xf32> to vector<2x32xf32>
    %256 = arith.mulf %253, %240 : vector<2x32xf32>
    %257 = arith.mulf %252, %254 : vector<2x32xf32>
    %258 = arith.addf %256, %257 : vector<2x32xf32>
    %259 = math.tanh %258 : vector<2x32xf32>
    %260 = arith.mulf %255, %259 : vector<2x32xf32>
    %261 = vector.extract_strided_slice %5 {offsets = [14, 0], sizes = [2, 128], strides = [1, 1]} : vector<16x256xf32> to vector<2x128xf32>
    %cst_37 = arith.constant dense<0.000000e+00> : vector<2x128xf32>
    %262 = tpu.matmul %260, %6, %cst_37 {dimension_numbers = #tpu.dot_dimension_numbers<[1], [0], [0], [1], [0, 0, 1, 1], [], []>} : vector<2x32xf32>, vector<32x128xf32>, vector<2x128xf32> -> vector<2x128xf32>
    %263 = arith.addf %261, %262 : vector<2x128xf32>
    %264 = arith.negf %263 : vector<2x128xf32>
    %265 = math.exp %264 : vector<2x128xf32>
    %cst_38 = arith.constant 1.000000e+00 : f32
    %266 = vector.broadcast %cst_38 : f32 to vector<2x128xf32>
    %267 = arith.addf %266, %265 : vector<2x128xf32>
    %268 = arith.divf %266, %267 : vector<2x128xf32>
    %269 = math.tanh %263 : vector<2x128xf32>
    %270 = vector.extract_strided_slice %268 {offsets = [0, 0], sizes = [2, 32], strides = [1, 1]} : vector<2x128xf32> to vector<2x32xf32>
    %271 = vector.extract_strided_slice %268 {offsets = [0, 32], sizes = [2, 32], strides = [1, 1]} : vector<2x128xf32> to vector<2x32xf32>
    %272 = vector.extract_strided_slice %269 {offsets = [0, 64], sizes = [2, 32], strides = [1, 1]} : vector<2x128xf32> to vector<2x32xf32>
    %273 = vector.extract_strided_slice %268 {offsets = [0, 96], sizes = [2, 32], strides = [1, 1]} : vector<2x128xf32> to vector<2x32xf32>
    %274 = arith.mulf %271, %258 : vector<2x32xf32>
    %275 = arith.mulf %270, %272 : vector<2x32xf32>
    %276 = arith.addf %274, %275 : vector<2x32xf32>
    %277 = math.tanh %276 : vector<2x32xf32>
    %278 = arith.mulf %273, %277 : vector<2x32xf32>
    %279 = vector.extract_strided_slice %5 {offsets = [14, 128], sizes = [2, 128], strides = [1, 1]} : vector<16x256xf32> to vector<2x128xf32>
    %cst_39 = arith.constant dense<0.000000e+00> : vector<2x128xf32>
    %280 = tpu.matmul %278, %6, %cst_39 {dimension_numbers = #tpu.dot_dimension_numbers<[1], [0], [0], [1], [0, 0, 1, 1], [], []>} : vector<2x32xf32>, vector<32x128xf32>, vector<2x128xf32> -> vector<2x128xf32>
    %281 = arith.addf %279, %280 : vector<2x128xf32>
    %282 = arith.negf %281 : vector<2x128xf32>
    %283 = math.exp %282 : vector<2x128xf32>
    %cst_40 = arith.constant 1.000000e+00 : f32
    %284 = vector.broadcast %cst_40 : f32 to vector<2x128xf32>
    %285 = arith.addf %284, %283 : vector<2x128xf32>
    %286 = arith.divf %284, %285 : vector<2x128xf32>
    %287 = math.tanh %281 : vector<2x128xf32>
    %288 = vector.extract_strided_slice %286 {offsets = [0, 0], sizes = [2, 32], strides = [1, 1]} : vector<2x128xf32> to vector<2x32xf32>
    %289 = vector.extract_strided_slice %286 {offsets = [0, 32], sizes = [2, 32], strides = [1, 1]} : vector<2x128xf32> to vector<2x32xf32>
    %290 = vector.extract_strided_slice %287 {offsets = [0, 64], sizes = [2, 32], strides = [1, 1]} : vector<2x128xf32> to vector<2x32xf32>
    %291 = vector.extract_strided_slice %286 {offsets = [0, 96], sizes = [2, 32], strides = [1, 1]} : vector<2x128xf32> to vector<2x32xf32>
    %292 = arith.mulf %289, %276 : vector<2x32xf32>
    %293 = arith.mulf %288, %290 : vector<2x32xf32>
    %294 = arith.addf %292, %293 : vector<2x32xf32>
    %295 = math.tanh %294 : vector<2x32xf32>
    %296 = arith.mulf %291, %295 : vector<2x32xf32>
    %c0_41 = arith.constant 0 : index
    %c0_42 = arith.constant 0 : index
    %297 = vector.load %arg4[%c0_41, %c0_42] : memref<32x2xf32, #tpu.memory_space<vmem>>, vector<32x2xf32>
    %cst_43 = arith.constant dense<0.000000e+00> : vector<2x2xf32>
    %298 = tpu.matmul %296, %297, %cst_43 {dimension_numbers = #tpu.dot_dimension_numbers<[1], [0], [0], [1], [0, 0, 1, 1], [], []>} : vector<2x32xf32>, vector<32x2xf32>, vector<2x2xf32> -> vector<2x2xf32>
    %c0_44 = arith.constant 0 : index
    %c0_45 = arith.constant 0 : index
    %299 = vector.load %arg5[%c0_44, %c0_45] : memref<1x2xf32, #tpu.memory_space<vmem>>, vector<1x2xf32>
    %300 = vector.broadcast %299 : vector<1x2xf32> to vector<2x2xf32>
    %301 = arith.addf %298, %300 : vector<2x2xf32>
    %cst_46 = arith.constant dense<0xFF800000> : vector<2xf32>
    %302 = vector.multi_reduction <maximumf>, %301, %cst_46 [1] : vector<2x2xf32> to vector<2xf32>
    %303 = vector.shape_cast %302 : vector<2xf32> to vector<2x1xf32>
    %304 = vector.broadcast %303 : vector<2x1xf32> to vector<2x2xf32>
    %305 = arith.subf %301, %304 : vector<2x2xf32>
    %306 = math.exp %305 : vector<2x2xf32>
    %cst_47 = arith.constant dense<0.000000e+00> : vector<2xf32>
    %307 = vector.multi_reduction <add>, %306, %cst_47 [1] : vector<2x2xf32> to vector<2xf32>
    %308 = vector.shape_cast %307 : vector<2xf32> to vector<2x1xf32>
    %309 = math.log %308 : vector<2x1xf32>
    %310 = arith.addf %303, %309 : vector<2x1xf32>
    %311 = vector.broadcast %310 : vector<2x1xf32> to vector<2x2xf32>
    %312 = arith.subf %301, %311 : vector<2x2xf32>
    %c0_48 = arith.constant 0 : index
    %c0_49 = arith.constant 0 : index
    %313 = vector.load %arg6[%c0_48, %c0_49] : memref<2x2xf32, #tpu.memory_space<vmem>>, vector<2x2xf32>
    tpu.vector_store %arg6[%c0_48, %c0_49], %312 {strides = array<i32>} : memref<2x2xf32, #tpu.memory_space<vmem>>, vector<2x2xf32>,
    return
  }
}

</mosaic_0001>

<bundles_post_ra>
// kernel: tpu_custom_call.1
= control target key start
LH: loop header
LB: loop body
LE: loop exit
PB: predicated region body
PF: predicated region fallthrough
CT: control target
= control target key end

     0   :  { %11 = vsyncpa [#allocation3], 0  ;;  %s1825_s0 = inlined_call_operand.hbm [shape: f32[16,48], index: 0, kind: input, shape index: {}]   ;;  %s1826_s1 = inlined_call_operand.hbm [shape: f32[48,256], index: 1, kind: input, shape index: {}]   ;;  %s1827_s2 = inlined_call_operand.vmem [shape: f32[1,256], index: 2, kind: input, shape index: {}]   ;;  %s1828_s3 = inlined_call_operand.vmem [shape: f32[32,128], index: 3, kind: input, shape index: {}]   ;;  %s1829_s4 = inlined_call_operand.vmem [shape: f32[32,2], index: 4, kind: input, shape index: {}]   ;;  %s1830_s5 = inlined_call_operand.vmem [shape: f32[1,2], index: 5, kind: input, shape index: {}]   ;;  %s1831_s6 = inlined_call_operand.hbm [shape: f32[2,2], index: 6, kind: output, shape index: {}]  }
   0x1   :  { %12 = vsyncpa [#allocation6], 0 }
   0x2   :  { %13 = vsyncpa [#allocation4], 0  ;;  %s18_s23 = sshll.u32 %s1825_s0, 4  ;;  %s1532_s24 = smov [#allocation2]   ;;  %s19_s23 = int_to_ptr.hbm [resolvable:$true] %s18_s23 }
   0x3   :  { %s20_s25 = sshll.u32 %s1532_s24, 4  ;;  %s31_s28 = sshll.u32 %s1826_s1, 4  ;;  %s21_s25 = int_to_ptr.vmem [resolvable:$true] %s20_s25  ;;  %s32_s28 = int_to_ptr.hbm [resolvable:$true] %s31_s28 }
   0x4   :  { %s1533_s29 = smov 128   ;;  %s1534_s30 = smov 8  }
   0x5   :  { %26 = dma.hbm_to_vmem [thread:$0]  %s19_s23, 256, %s21_s25, [#allocation3], %s1533_s29, %s1533_s29, %s1534_s30  }
   0x6   :  { %s1535_s7 = smov [#allocation5]   ;;  %s1536_s9 = smov 256  }
   0x7   :  { %s33_s8 = sshll.u32 %s1535_s7, 4  ;;  %s1537_s10 = smov 16   ;;  %s34_s8 = int_to_ptr.vmem [resolvable:$true] %s33_s8 }
   0x8   :  { %39 = dma.hbm_to_vmem [thread:$0]  %s32_s28, 1536, %s34_s8, [#allocation6], %s1536_s9, %s1536_s9, %s1537_s10  }
   0x9   :  { %1526 = dma.done.wait [#allocation3], 256  }
   0xa   :  { %1527 = vsyncadd [#allocation3], 4294967040 }
   0xb   :  { %1528 = dma.done.wait [#allocation6], 1536  }
   0xc   :  { %1529 = vsyncadd [#allocation6], 4294965760  ;;  %v68_v0 = vld [vmem:[#allocation5 + $0x50] sm:$0xff]  ;;  %v1586_v1 = vld [vmem:[%s1828_s3 + $0x18] sm:$0xff]  ;;  %v1538_v9 = vmov 0.0   ;;  %vm76_vm0 = vcmask 392192  }
   0xd   :  { %v66_v2 = vld [vmem:[#allocation5 + $0x40] sm:$0xff]  ;;  %93 = vmatpush.msra.mxu0 %v68_v0  ;;  %149 = vmatpush.msra.mxu2 %v1586_v1  ;;  %v64_v4 = vld [vmem:[#allocation5 + $0x30] sm:$0xff]  ;;  %v1597_v5 = vld [vmem:[%s1828_s3 + $0x8] sm:$0xff]  ;;  %s1539_s18 = smov 64   ;;  %vm133_vm5 = vcmask 261120   ;;  %s1264_s7 = sshll.u32 %s1831_s6, 4  ;;  %s1265_s7 = int_to_ptr.hbm [resolvable:$true] %s1264_s7 }
   0xe   :  { %v1592_v3 = vld [vmem:[%s1828_s3 + $0x10] sm:$0xff]  ;;  %212 = vmatpush.msra.mxu3 %v1586_v1  ;;  %v1604_v7 = vld [vmem:[%s1828_s3] sm:$0xff]  ;;  %v69_v38 = vld [vmem:[#allocation5 + $0x58] sm:$0xff] }
   0xf   :  { %94 = vmatpush.msra.mxu0 %v66_v2  ;;  %150 = vmatpush.msra.mxu2 %v1592_v3  ;;  %v62_v6 = vld [vmem:[#allocation5 + $0x20] sm:$0xff]  ;;  %v60_v8 = vld [vmem:[#allocation5 + $0x10] sm:$0xff]  ;;  %v67_v39 = vld [vmem:[#allocation5 + $0x48] sm:$0xff] }
  0x10   :  { %213 = vmatpush.msra.mxu3 %v1592_v3  ;;  %v58_v10 = vld [vmem:[#allocation5] sm:$0xff]  ;;  %v1611_v11 = vld [vmem:[#allocation2] sm:$0xff]  ;;  %116 = vmatpush.msra.mxu1 %v69_v38  ;;  %v65_v40 = vld [vmem:[#allocation5 + $0x38] sm:$0xff] }
  0x11   :  { %95 = vmatpush.msra.mxu0 %v64_v4  ;;  %151 = vmatpush.msra.mxu2 %v1597_v5  ;;  %v1638_v12 = vld [vmem:[%s1827_s2] sm:$0x3]  ;;  %s1540_s2 = smov 32   ;;  %v63_v41 = vld [vmem:[#allocation5 + $0x28] sm:$0xff]  ;;  %v61_v44 = vld [vmem:[#allocation5 + $0x18] sm:$0xff] }
  0x12   :  { %214 = vmatpush.msra.mxu3 %v1597_v5  ;;  %v72_v13 = vperm.slane %v1638_v12, 0  ;;  %117 = vmatpush.msra.mxu1 %v67_v39  ;;  %v59_v45 = vld [vmem:[#allocation5 + $0x8] sm:$0xff]  ;;  %v73_v47 = vperm.slane %v1638_v12, 1 }
  0x13   :  { %96 = vmatpush.msra.mxu0 %v62_v6  ;;  %152 = vmatpush.msra.mxu2 %v1604_v7 }
  0x14   :  { %153 = vmatmul.f32.vlgmr.msra.gmra.mxu2 %v1538_v9  ;;  %215 = vmatpush.msra.mxu3 %v1604_v7 }
  0x15   :  { %97 = vmatpush.msra.mxu0 %v60_v8  ;;  %275 = vmatpush.msrb.mxu2 %v1586_v1 }
  0x16   :  { %345 = vmatpush.msrb.mxu3 %v1586_v1  ;;  %118 = vmatpush.msra.mxu1 %v65_v40 }
  0x17   :  { %98 = vmatpush.msra.mxu0 %v58_v10  ;;  %276 = vmatpush.msrb.mxu2 %v1592_v3 }
  0x18   :  { %1275 = vmatmul.msk.f32.vlgmr.msra.gmra.mxu0 %vm76_vm0, %v1611_v11  ;;  %346 = vmatpush.msrb.mxu3 %v1592_v3 }
  0x19   :  { %277 = vmatpush.msrb.mxu2 %v1597_v5  ;;  %549 = vmatpush.msrb.mxu0 %v1586_v1 }
  0x1a   :  { %347 = vmatpush.msrb.mxu3 %v1597_v5  ;;  %119 = vmatpush.msra.mxu1 %v63_v41 }
  0x1b   :  { %278 = vmatpush.msrb.mxu2 %v1604_v7  ;;  %550 = vmatpush.msrb.mxu0 %v1592_v3 }
  0x1c   :  { %348 = vmatpush.msrb.mxu3 %v1604_v7  ;;  %120 = vmatpush.msra.mxu1 %v61_v44 }
  0x1d   :  { %412 = vmatpush.msra.mxu2 %v1586_v1  ;;  %551 = vmatpush.msrb.mxu0 %v1597_v5 }
  0x1e   :  { %121 = vmatpush.msra.mxu1 %v59_v45 }
  0x1f   :  { %413 = vmatpush.msra.mxu2 %v1592_v3  ;;  %552 = vmatpush.msrb.mxu0 %v1604_v7 }
  0x20   :  { %1277 = vmatmul.msk.f32.vlgmr.msra.gmra.mxu1 %vm76_vm0, %v1611_v11 }
  0x21   :  { %414 = vmatpush.msra.mxu2 %v1597_v5  ;;  %815 = vmatpush.msra.mxu0 %v1586_v1 }
  0x22   :  { %619 = vmatpush.msrb.mxu1 %v1586_v1 }
  0x23   :  { %415 = vmatpush.msra.mxu2 %v1604_v7  ;;  %816 = vmatpush.msra.mxu0 %v1592_v3 }
  0x24   :  { %620 = vmatpush.msrb.mxu1 %v1592_v3 }
  0x25   :  { %817 = vmatpush.msra.mxu0 %v1597_v5 }
  0x26   :  { %621 = vmatpush.msrb.mxu1 %v1597_v5 }
  0x27   :  { %818 = vmatpush.msra.mxu0 %v1604_v7 }
  0x28   :  { %622 = vmatpush.msrb.mxu1 %v1604_v7 }
  0x2a   :  { %885 = vmatpush.msra.mxu1 %v1586_v1 }
  0x2c   :  { %886 = vmatpush.msra.mxu1 %v1592_v3 }
  0x2e   :  { %887 = vmatpush.msra.mxu1 %v1597_v5 }
  0x30   :  { %888 = vmatpush.msra.mxu1 %v1604_v7 }
  0x95   :  { %v100_v14 = vpop.f32.mrf.mxu0 }
  0x96   :  { %v1643_v15 = vadd.f32 %v100_v14, %v72_v13 }
  0x97   :  { %v154_v16 = vpop.f32.mrf.mxu2 }
  0x98   :  { %v157_v17 = vadd.f32 %v154_v16, %v1643_v15 }
  0x9a   :  { %1322 = vtanh.f32 %v157_v17  ;;  %v1279_v19 = vmul.f32 -1.442695, %v157_v17 }
  0x9c   :  { %1324 = vpow2.f32 %v1279_v19 }
  0x9d   :  { %v123_v48 = vpop.f32.mrf.mxu1 }
  0x9e   :  { %v1671_v49 = vadd.f32 %v123_v48, %v73_v47 }
  0xa0   :  { %v1323_v18 = vpop.eup %1322 }
  0xa1   :  { %180 = vrot.lane.b32.xlu0 %v1323_v18, %s1539_s18 }
  0xa2   :  { %v1325_v20 = vpop.eup %1324 }
  0xa3   :  { %v161_v21 = vadd.f32 1.0, %v1325_v20 }
  0xa5   :  { %1326 = vrcp.f32 %v161_v21  ;;  %v173_v27 = vand.u32 2147483648, %v161_v21  ;;  %vm167_vm2 = vweird.f32 %v161_v21  ;;  %v171_v28 = vand.u32 2147483647, %v161_v21 }
  0xa7   :  { %v174_v30 = vor.u32 1.1754944e-38, %v173_v27  ;;  %vm172_vm4 = vcmp.eq.f32.partialorder %v171_v28, 8.507059e+37 }
  0xab   :  { %v1327_v22 = vpop.eup %1326 }
  0xac   :  { %v163_v23 = vmul.f32 %v1327_v22, %v161_v21  ;;  %vm168_vm1 = vweird.f32 %v1327_v22 }
  0xad   :  { %vm169_vm3 = vmor %vm167_vm2, %vm168_vm1 }
  0xae   :  { %v164_v24 = vsub.f32 1.0, %v163_v23 }
  0xb0   :  { %v165_v25 = vmul.f32 %v1327_v22, %v164_v24 }
  0xb2   :  { %v166_v26 = vadd.f32 %v1327_v22, %v165_v25 }
  0xb4   :  { %v170_v29 = vsel %vm169_vm3, %v1327_v22, %v166_v26 }
  0xb5   :  { %v175_v32 = vsel %vm172_vm4, %v174_v30, %v170_v29 }
  0xb6   :  { %v178_v34 = vmul.f32 0.0, %v175_v32 }
 0x113   :  { %v181_v31 = vpop.permute.xlu0 %180 }
 0x114   :  { %v183_v33 = vmul.f32 %v181_v31, %v175_v32 }
 0x116   :  { %185 = vrot.lane.b32.xlu0 %v183_v33, %s1540_s2 }
 0x188   :  { %v186_v35 = vpop.permute.xlu0 %185 }
 0x189   :  { %v1648_v36 = vadd.f32 %v186_v35, %v178_v34 }
 0x18b   :  { %1328 = vtanh.f32 %v1648_v36 }
 0x191   :  { %v1329_v37 = vpop.eup %1328 }
 0x192   :  { %191 = vrot.lane.b32.xlu1 %v1329_v37, %s1539_s18 }
 0x204   :  { %v192_v42 = vpop.permute.xlu1 %191 }
 0x205   :  { %v194_v43 = vmul.f32 %v192_v42, %v175_v32 }
 0x207   :  { %196 = vrot.lane.b32.xlu1 %v194_v43, %s1540_s2 }
 0x279   :  { %v197_v46 = vpop.permute.xlu1 %196 }
 0x27a   :  { %1280 = vmatmul.msk.f32.vlgmr.msra.gmra.mxu3 %vm133_vm5, %v197_v46 }
 0x27b   :  { %482 = vmatpush.msra.mxu3 %v1586_v1 }
 0x27d   :  { %483 = vmatpush.msra.mxu3 %v1592_v3 }
 0x27f   :  { %484 = vmatpush.msra.mxu3 %v1597_v5 }
 0x281   :  { %485 = vmatpush.msra.mxu3 %v1604_v7 }
 0x2fd   :  { %v217_v50 = vpop.f32.mrf.mxu3 }
 0x2fe   :  { %v220_v51 = vadd.f32 %v217_v50, %v1671_v49 }
 0x300   :  { %1330 = vtanh.f32 %v220_v51  ;;  %v1281_v53 = vmul.f32 -1.442695, %v220_v51 }
 0x302   :  { %1332 = vpow2.f32 %v1281_v53 }
 0x306   :  { %v1331_v52 = vpop.eup %1330 }
 0x307   :  { %243 = vrot.lane.b32.xlu2 %v1331_v52, %s1539_s18 }
 0x308   :  { %v1333_v54 = vpop.eup %1332 }
 0x309   :  { %v224_v55 = vadd.f32 1.0, %v1333_v54 }
 0x30b   :  { %1334 = vrcp.f32 %v224_v55  ;;  %v236_v61 = vand.u32 2147483648, %v224_v55  ;;  %vm230_vm7 = vweird.f32 %v224_v55  ;;  %v234_v62 = vand.u32 2147483647, %v224_v55 }
 0x30d   :  { %v237_v0 = vor.u32 1.1754944e-38, %v236_v61  ;;  %vm235_vm9 = vcmp.eq.f32.partialorder %v234_v62, 8.507059e+37 }
 0x311   :  { %v1335_v56 = vpop.eup %1334 }
 0x312   :  { %v226_v57 = vmul.f32 %v1335_v56, %v224_v55  ;;  %vm231_vm6 = vweird.f32 %v1335_v56 }
 0x313   :  { %vm232_vm8 = vmor %vm230_vm7, %vm231_vm6 }
 0x314   :  { %v227_v58 = vsub.f32 1.0, %v226_v57 }
 0x316   :  { %v228_v59 = vmul.f32 %v1335_v56, %v227_v58 }
 0x318   :  { %v229_v60 = vadd.f32 %v1335_v56, %v228_v59 }
 0x31a   :  { %v233_v63 = vsel %vm232_vm8, %v1335_v56, %v229_v60 }
 0x31b   :  { %v238_v4 = vsel %vm235_vm9, %v237_v0, %v233_v63 }
 0x31c   :  { %v241_v8 = vmul.f32 %v238_v4, %v1648_v36 }
 0x361   :  { %v244_v2 = vpop.permute.xlu2 %243 }
 0x362   :  { %v246_v6 = vmul.f32 %v244_v2, %v238_v4 }
 0x364   :  { %248 = vrot.lane.b32.xlu2 %v246_v6, %s1540_s2 }
 0x3be   :  { %v249_v9 = vpop.permute.xlu2 %248 }
 0x3bf   :  { %v251_v10 = vadd.f32 %v249_v9, %v241_v8 }
 0x3c1   :  { %1336 = vtanh.f32 %v251_v10  ;;  %v308_v37 = vrot.slane %v251_v10, 6 }
 0x3c7   :  { %v1337_v11 = vpop.eup %1336 }
 0x3c8   :  { %254 = vrot.lane.b32.xlu0 %v1337_v11, %s1539_s18 }
 0x43a   :  { %v255_v14 = vpop.permute.xlu0 %254 }
 0x43b   :  { %v257_v16 = vmul.f32 %v255_v14, %v238_v4 }
 0x43d   :  { %259 = vrot.lane.b32.xlu1 %v257_v16, %s1540_s2 }
 0x4af   :  { %v260_v17 = vpop.permute.xlu1 %259 }
 0x4b0   :  { %1282 = vmatmul.msk.f32.vlgmr.msrb.gmra.mxu2 %vm133_vm5, %v260_v17 }
 0x4b1   :  { %686 = vmatpush.msrb.mxu2 %v1586_v1 }
 0x4b3   :  { %687 = vmatpush.msrb.mxu2 %v1592_v3 }
 0x4b5   :  { %688 = vmatpush.msrb.mxu2 %v1597_v5 }
 0x4b7   :  { %689 = vmatpush.msrb.mxu2 %v1604_v7 }
 0x533   :  { %v280_v18 = vpop.f32.mrf.mxu2 }
 0x534   :  { %v284_v19 = vrot.slane %v280_v18, 6 }
 0x536   :  { %v286_v20 = vadd.f32 %v284_v19, %v1643_v15 }
 0x538   :  { %1338 = vtanh.f32 %v286_v20  ;;  %v1283_v22 = vmul.f32 -1.442695, %v286_v20 }
 0x53a   :  { %1340 = vpow2.f32 %v1283_v22 }
 0x53e   :  { %v1339_v21 = vpop.eup %1338 }
 0x53f   :  { %312 = vrot.lane.b32.xlu2 %v1339_v21, %s1539_s18 }
 0x540   :  { %v1341_v23 = vpop.eup %1340 }
 0x541   :  { %v290_v24 = vadd.f32 1.0, %v1341_v23 }
 0x543   :  { %1342 = vrcp.f32 %v290_v24  ;;  %v302_v30 = vand.u32 2147483648, %v290_v24  ;;  %vm296_vm11 = vweird.f32 %v290_v24  ;;  %v300_v31 = vand.u32 2147483647, %v290_v24 }
 0x545   :  { %v303_v33 = vor.u32 1.1754944e-38, %v302_v30  ;;  %vm301_vm13 = vcmp.eq.f32.partialorder %v300_v31, 8.507059e+37 }
 0x549   :  { %v1343_v25 = vpop.eup %1342 }
 0x54a   :  { %v292_v26 = vmul.f32 %v1343_v25, %v290_v24  ;;  %vm297_vm10 = vweird.f32 %v1343_v25 }
 0x54b   :  { %vm298_vm12 = vmor %vm296_vm11, %vm297_vm10 }
 0x54c   :  { %v293_v27 = vsub.f32 1.0, %v292_v26 }
 0x54e   :  { %v294_v28 = vmul.f32 %v1343_v25, %v293_v27 }
 0x550   :  { %v295_v29 = vadd.f32 %v1343_v25, %v294_v28 }
 0x552   :  { %v299_v32 = vsel %vm298_vm12, %v1343_v25, %v295_v29 }
 0x553   :  { %v304_v35 = vsel %vm301_vm13, %v303_v33, %v299_v32 }
 0x554   :  { %v310_v38 = vmul.f32 %v308_v37, %v304_v35 }
 0x599   :  { %v313_v34 = vpop.permute.xlu2 %312 }
 0x59a   :  { %v315_v36 = vmul.f32 %v313_v34, %v304_v35 }
 0x59c   :  { %317 = vrot.lane.b32.xlu0 %v315_v36, %s1540_s2 }
 0x60e   :  { %v318_v39 = vpop.permute.xlu0 %317 }
 0x60f   :  { %v320_v40 = vadd.f32 %v318_v39, %v310_v38 }
 0x611   :  { %1344 = vtanh.f32 %v320_v40 }
 0x617   :  { %v1345_v41 = vpop.eup %1344 }
 0x618   :  { %323 = vrot.lane.b32.xlu1 %v1345_v41, %s1539_s18 }
 0x68a   :  { %v324_v42 = vpop.permute.xlu1 %323 }
 0x68b   :  { %v326_v43 = vmul.f32 %v324_v42, %v304_v35 }
 0x68d   :  { %v328_v44 = vrot.slane %v326_v43, 2 }
 0x68f   :  { %329 = vrot.lane.b32.xlu2 %v328_v44, %s1540_s2 }
 0x6e9   :  { %v330_v45 = vpop.permute.xlu2 %329 }
 0x6ea   :  { %1284 = vmatmul.msk.f32.vlgmr.msrb.gmra.mxu3 %vm133_vm5, %v330_v45 }
 0x6eb   :  { %752 = vmatpush.msrb.mxu3 %v1586_v1 }
 0x6ed   :  { %753 = vmatpush.msrb.mxu3 %v1592_v3 }
 0x6ef   :  { %754 = vmatpush.msrb.mxu3 %v1597_v5 }
 0x6f1   :  { %755 = vmatpush.msrb.mxu3 %v1604_v7 }
 0x76d   :  { %v350_v46 = vpop.f32.mrf.mxu3 }
 0x76e   :  { %v354_v48 = vrot.slane %v350_v46, 6 }
 0x770   :  { %v356_v50 = vadd.f32 %v354_v48, %v1671_v49 }
 0x772   :  { %1346 = vtanh.f32 %v356_v50  ;;  %v1285_v52 = vmul.f32 -1.442695, %v356_v50 }
 0x774   :  { %1348 = vpow2.f32 %v1285_v52 }
 0x778   :  { %v1347_v51 = vpop.eup %1346 }
 0x779   :  { %379 = vrot.lane.b32.xlu0 %v1347_v51, %s1539_s18 }
 0x77a   :  { %v1349_v53 = vpop.eup %1348 }
 0x77b   :  { %v360_v54 = vadd.f32 1.0, %v1349_v53 }
 0x77d   :  { %1350 = vrcp.f32 %v360_v54  ;;  %v372_v60 = vand.u32 2147483648, %v360_v54  ;;  %vm366_vm15 = vweird.f32 %v360_v54  ;;  %v370_v61 = vand.u32 2147483647, %v360_v54 }
 0x77f   :  { %v373_v63 = vor.u32 1.1754944e-38, %v372_v60  ;;  %vm371_vm2 = vcmp.eq.f32.partialorder %v370_v61, 8.507059e+37 }
 0x783   :  { %v1351_v55 = vpop.eup %1350 }
 0x784   :  { %v362_v56 = vmul.f32 %v1351_v55, %v360_v54  ;;  %vm367_vm14 = vweird.f32 %v1351_v55 }
 0x785   :  { %vm368_vm1 = vmor %vm366_vm15, %vm367_vm14 }
 0x786   :  { %v363_v57 = vsub.f32 1.0, %v362_v56 }
 0x788   :  { %v364_v58 = vmul.f32 %v1351_v55, %v363_v57 }
 0x78a   :  { %v365_v59 = vadd.f32 %v1351_v55, %v364_v58 }
 0x78c   :  { %v369_v62 = vsel %vm368_vm1, %v1351_v55, %v365_v59 }
 0x78d   :  { %v374_v2 = vsel %vm371_vm2, %v373_v63, %v369_v62 }
 0x78e   :  { %v377_v6 = vmul.f32 %v374_v2, %v320_v40 }
 0x7eb   :  { %v380_v0 = vpop.permute.xlu0 %379 }
 0x7ec   :  { %v382_v4 = vmul.f32 %v380_v0, %v374_v2 }
 0x7ee   :  { %384 = vrot.lane.b32.xlu1 %v382_v4, %s1540_s2 }
 0x860   :  { %v385_v8 = vpop.permute.xlu1 %384 }
 0x861   :  { %v387_v9 = vadd.f32 %v385_v8, %v377_v6 }
 0x863   :  { %1352 = vtanh.f32 %v387_v9  ;;  %v445_v37 = vrot.slane %v387_v9, 6 }
 0x869   :  { %v1353_v10 = vpop.eup %1352 }
 0x86a   :  { %390 = vrot.lane.b32.xlu2 %v1353_v10, %s1539_s18 }
 0x8c4   :  { %v391_v11 = vpop.permute.xlu2 %390 }
 0x8c5   :  { %v393_v14 = vmul.f32 %v391_v11, %v374_v2  ;;  %v57_v11 = vld [vmem:[#allocation2 + $0x8] sm:$0xff] }
 0x8c6   :  { %1276 = vmatmul.msk.f32.gmra.mxu0 %vm76_vm0, %v57_v11  ;;  %1278 = vmatmul.msk.f32.gmra.mxu1 %vm76_vm0, %v57_v11 }
 0x8c7   :  { %v395_v16 = vrot.slane %v393_v14, 2 }
 0x8c9   :  { %396 = vrot.lane.b32.xlu0 %v395_v16, %s1540_s2 }
 0x93b   :  { %v397_v17 = vpop.permute.xlu0 %396 }
 0x93c   :  { %1286 = vmatmul.msk.f32.vlgmr.msra.gmra.mxu2 %vm133_vm5, %v397_v17 }
 0x93d   :  { %952 = vmatpush.msra.mxu2 %v1586_v1 }
 0x93f   :  { %953 = vmatpush.msra.mxu2 %v1592_v3 }
 0x941   :  { %954 = vmatpush.msra.mxu2 %v1597_v5 }
 0x943   :  { %955 = vmatpush.msra.mxu2 %v1604_v7 }
 0x9bf   :  { %v417_v18 = vpop.f32.mrf.mxu2 }
 0x9c0   :  { %v421_v19 = vrot.slane %v417_v18, 4 }
 0x9c2   :  { %v423_v20 = vadd.f32 %v421_v19, %v1643_v15  ;;  %v1726_v19 = vpop.f32.mrf.mxu0 }
 0x9c4   :  { %1354 = vtanh.f32 %v423_v20  ;;  %v1287_v22 = vmul.f32 -1.442695, %v423_v20 }
 0x9c6   :  { %1356 = vpow2.f32 %v1287_v22 }
 0x9ca   :  { %v1355_v21 = vpop.eup %1354 }
 0x9cb   :  { %449 = vrot.lane.b32.xlu1 %v1355_v21, %s1539_s18 }
 0x9cc   :  { %v1357_v23 = vpop.eup %1356 }
 0x9cd   :  { %v427_v24 = vadd.f32 1.0, %v1357_v23 }
 0x9cf   :  { %1358 = vrcp.f32 %v427_v24  ;;  %v439_v30 = vand.u32 2147483648, %v427_v24  ;;  %vm433_vm4 = vweird.f32 %v427_v24  ;;  %v437_v31 = vand.u32 2147483647, %v427_v24 }
 0x9d1   :  { %v440_v33 = vor.u32 1.1754944e-38, %v439_v30  ;;  %vm438_vm7 = vcmp.eq.f32.partialorder %v437_v31, 8.507059e+37 }
 0x9d5   :  { %v1359_v25 = vpop.eup %1358 }
 0x9d6   :  { %v429_v26 = vmul.f32 %v1359_v25, %v427_v24  ;;  %vm434_vm3 = vweird.f32 %v1359_v25 }
 0x9d7   :  { %vm435_vm6 = vmor %vm433_vm4, %vm434_vm3 }
 0x9d8   :  { %v430_v27 = vsub.f32 1.0, %v429_v26 }
 0x9da   :  { %v431_v28 = vmul.f32 %v1359_v25, %v430_v27 }
 0x9dc   :  { %v432_v29 = vadd.f32 %v1359_v25, %v431_v28 }
 0x9de   :  { %v436_v32 = vsel %vm435_vm6, %v1359_v25, %v432_v29 }
 0x9df   :  { %v441_v35 = vsel %vm438_vm7, %v440_v33, %v436_v32 }
 0x9e0   :  { %v447_v38 = vmul.f32 %v445_v37, %v441_v35 }
 0xa3d   :  { %v450_v34 = vpop.permute.xlu1 %449 }
 0xa3e   :  { %v452_v36 = vmul.f32 %v450_v34, %v441_v35 }
 0xa40   :  { %454 = vrot.lane.b32.xlu2 %v452_v36, %s1540_s2 }
 0xa9a   :  { %v455_v39 = vpop.permute.xlu2 %454 }
 0xa9b   :  { %v457_v40 = vadd.f32 %v455_v39, %v447_v38 }
 0xa9d   :  { %1360 = vtanh.f32 %v457_v40 }
 0xaa3   :  { %v1361_v41 = vpop.eup %1360 }
 0xaa4   :  { %460 = vrot.lane.b32.xlu0 %v1361_v41, %s1539_s18 }
 0xb16   :  { %v461_v42 = vpop.permute.xlu0 %460 }
 0xb17   :  { %v463_v43 = vmul.f32 %v461_v42, %v441_v35 }
 0xb19   :  { %v465_v44 = vrot.slane %v463_v43, 4 }
 0xb1b   :  { %466 = vrot.lane.b32.xlu1 %v465_v44, %s1540_s2 }
 0xb8d   :  { %v467_v45 = vpop.permute.xlu1 %466 }
 0xb8e   :  { %1288 = vmatmul.msk.f32.vlgmr.msra.gmra.mxu3 %vm133_vm5, %v467_v45 }
 0xb8f   :  { %1022 = vmatpush.msra.mxu3 %v1586_v1 }
 0xb91   :  { %1023 = vmatpush.msra.mxu3 %v1592_v3 }
 0xb93   :  { %1024 = vmatpush.msra.mxu3 %v1597_v5 }
 0xb95   :  { %1025 = vmatpush.msra.mxu3 %v1604_v7 }
 0xc11   :  { %v487_v46 = vpop.f32.mrf.mxu3 }
 0xc12   :  { %v491_v48 = vrot.slane %v487_v46, 4 }
 0xc14   :  { %v493_v50 = vadd.f32 %v491_v48, %v1671_v49  ;;  %v1738_v48 = vpop.f32.mrf.mxu1 }
 0xc16   :  { %1362 = vtanh.f32 %v493_v50  ;;  %v1289_v52 = vmul.f32 -1.442695, %v493_v50 }
 0xc18   :  { %1364 = vpow2.f32 %v1289_v52 }
 0xc1c   :  { %v1363_v51 = vpop.eup %1362 }
 0xc1d   :  { %516 = vrot.lane.b32.xlu2 %v1363_v51, %s1539_s18 }
 0xc1e   :  { %v1365_v53 = vpop.eup %1364 }
 0xc1f   :  { %v497_v54 = vadd.f32 1.0, %v1365_v53 }
 0xc21   :  { %1366 = vrcp.f32 %v497_v54  ;;  %v509_v60 = vand.u32 2147483648, %v497_v54  ;;  %vm503_vm9 = vweird.f32 %v497_v54  ;;  %v507_v61 = vand.u32 2147483647, %v497_v54 }
 0xc23   :  { %v510_v63 = vor.u32 1.1754944e-38, %v509_v60  ;;  %vm508_vm11 = vcmp.eq.f32.partialorder %v507_v61, 8.507059e+37 }
 0xc27   :  { %v1367_v55 = vpop.eup %1366 }
 0xc28   :  { %v499_v56 = vmul.f32 %v1367_v55, %v497_v54  ;;  %vm504_vm8 = vweird.f32 %v1367_v55 }
 0xc29   :  { %vm505_vm10 = vmor %vm503_vm9, %vm504_vm8 }
 0xc2a   :  { %v500_v57 = vsub.f32 1.0, %v499_v56 }
 0xc2c   :  { %v501_v58 = vmul.f32 %v1367_v55, %v500_v57 }
 0xc2e   :  { %v502_v59 = vadd.f32 %v1367_v55, %v501_v58 }
 0xc30   :  { %v506_v62 = vsel %vm505_vm10, %v1367_v55, %v502_v59 }
 0xc31   :  { %v511_v2 = vsel %vm508_vm11, %v510_v63, %v506_v62 }
 0xc32   :  { %v514_v6 = vmul.f32 %v511_v2, %v457_v40 }
 0xc77   :  { %v517_v0 = vpop.permute.xlu2 %516 }
 0xc78   :  { %v519_v4 = vmul.f32 %v517_v0, %v511_v2 }
 0xc7a   :  { %521 = vrot.lane.b32.xlu0 %v519_v4, %s1540_s2 }
 0xcec   :  { %v522_v8 = vpop.permute.xlu0 %521 }
 0xced   :  { %v524_v9 = vadd.f32 %v522_v8, %v514_v6 }
 0xcef   :  { %1368 = vtanh.f32 %v524_v9  ;;  %v582_v38 = vrot.slane %v524_v9, 6 }
 0xcf5   :  { %v1369_v10 = vpop.eup %1368 }
 0xcf6   :  { %527 = vrot.lane.b32.xlu1 %v1369_v10, %s1539_s18 }
 0xd68   :  { %v528_v14 = vpop.permute.xlu1 %527 }
 0xd69   :  { %v530_v16 = vmul.f32 %v528_v14, %v511_v2  ;;  %v1749_v14 = vadd.f32 %v1726_v19, %v72_v13 }
 0xd6b   :  { %v532_v17 = vrot.slane %v530_v16, 4 }
 0xd6d   :  { %533 = vrot.lane.b32.xlu2 %v532_v17, %s1540_s2 }
 0xdc7   :  { %v534_v18 = vpop.permute.xlu2 %533 }
 0xdc8   :  { %1290 = vmatmul.msk.f32.vlgmr.msrb.gmra.mxu0 %vm133_vm5, %v534_v18 }
 0xdc9   :  { %1089 = vmatpush.msrb.mxu0 %v1586_v1 }
 0xdcb   :  { %1090 = vmatpush.msrb.mxu0 %v1592_v3 }
 0xdcd   :  { %1091 = vmatpush.msrb.mxu0 %v1597_v5 }
 0xdcf   :  { %1092 = vmatpush.msrb.mxu0 %v1604_v7 }
 0xe45   :  { %v554_v20 = vpop.f32.mrf.mxu0 }
 0xe46   :  { %v558_v21 = vrot.slane %v554_v20, 2 }
 0xe48   :  { %v560_v22 = vadd.f32 %v558_v21, %v1643_v15 }
 0xe4a   :  { %1370 = vtanh.f32 %v560_v22  ;;  %v1291_v24 = vmul.f32 -1.442695, %v560_v22 }
 0xe4c   :  { %1372 = vpow2.f32 %v1291_v24 }
 0xe50   :  { %v1371_v23 = vpop.eup %1370 }
 0xe51   :  { %586 = vrot.lane.b32.xlu0 %v1371_v23, %s1539_s18 }
 0xe52   :  { %v1373_v25 = vpop.eup %1372 }
 0xe53   :  { %v564_v26 = vadd.f32 1.0, %v1373_v25 }
 0xe55   :  { %1374 = vrcp.f32 %v564_v26  ;;  %v576_v32 = vand.u32 2147483648, %v564_v26  ;;  %vm570_vm12 = vweird.f32 %v564_v26  ;;  %v574_v33 = vand.u32 2147483647, %v564_v26 }
 0xe57   :  { %v577_v34 = vor.u32 1.1754944e-38, %v576_v32  ;;  %vm575_vm14 = vcmp.eq.f32.partialorder %v574_v33, 8.507059e+37 }
 0xe5b   :  { %v1375_v27 = vpop.eup %1374 }
 0xe5c   :  { %v566_v28 = vmul.f32 %v1375_v27, %v564_v26  ;;  %vm571_vm0 = vweird.f32 %v1375_v27 }
 0xe5d   :  { %vm572_vm13 = vmor %vm570_vm12, %vm571_vm0 }
 0xe5e   :  { %v567_v29 = vsub.f32 1.0, %v566_v28 }
 0xe60   :  { %v568_v30 = vmul.f32 %v1375_v27, %v567_v29 }
 0xe62   :  { %v569_v31 = vadd.f32 %v1375_v27, %v568_v30 }
 0xe64   :  { %v573_v15 = vsel %vm572_vm13, %v1375_v27, %v569_v31 }
 0xe65   :  { %v578_v36 = vsel %vm575_vm14, %v577_v34, %v573_v15 }
 0xe66   :  { %v584_v39 = vmul.f32 %v582_v38, %v578_v36 }
 0xec3   :  { %v587_v35 = vpop.permute.xlu0 %586 }
 0xec4   :  { %v589_v37 = vmul.f32 %v587_v35, %v578_v36 }
 0xec6   :  { %591 = vrot.lane.b32.xlu1 %v589_v37, %s1540_s2 }
 0xf38   :  { %v592_v40 = vpop.permute.xlu1 %591 }
 0xf39   :  { %v594_v41 = vadd.f32 %v592_v40, %v584_v39  ;;  %v1760_v40 = vadd.f32 %v1738_v48, %v73_v47 }
 0xf3b   :  { %1376 = vtanh.f32 %v594_v41 }
 0xf41   :  { %v1377_v42 = vpop.eup %1376 }
 0xf42   :  { %597 = vrot.lane.b32.xlu2 %v1377_v42, %s1539_s18 }
 0xf9c   :  { %v598_v43 = vpop.permute.xlu2 %597 }
 0xf9d   :  { %v600_v44 = vmul.f32 %v598_v43, %v578_v36 }
 0xf9f   :  { %v602_v45 = vrot.slane %v600_v44, 6 }
 0xfa1   :  { %603 = vrot.lane.b32.xlu0 %v602_v45, %s1540_s2 }
0x1013   :  { %v604_v46 = vpop.permute.xlu0 %603 }
0x1014   :  { %1292 = vmatmul.msk.f32.vlgmr.msrb.gmra.mxu1 %vm133_vm5, %v604_v46 }
0x1015   :  { %1159 = vmatpush.msrb.mxu1 %v1586_v1 }
0x1017   :  { %1160 = vmatpush.msrb.mxu1 %v1592_v3 }
0x1019   :  { %1161 = vmatpush.msrb.mxu1 %v1597_v5 }
0x101b   :  { %1162 = vmatpush.msrb.mxu1 %v1604_v7 }
0x1091   :  { %v624_v50 = vpop.f32.mrf.mxu1 }
0x1092   :  { %v628_v51 = vrot.slane %v624_v50, 2 }
0x1094   :  { %v630_v52 = vadd.f32 %v628_v51, %v1671_v49 }
0x1096   :  { %1378 = vtanh.f32 %v630_v52  ;;  %v1293_v54 = vmul.f32 -1.442695, %v630_v52 }
0x1098   :  { %1380 = vpow2.f32 %v1293_v54 }
0x109c   :  { %v1379_v53 = vpop.eup %1378 }
0x109d   :  { %653 = vrot.lane.b32.xlu1 %v1379_v53, %s1539_s18 }
0x109e   :  { %v1381_v55 = vpop.eup %1380 }
0x109f   :  { %v634_v1 = vadd.f32 1.0, %v1381_v55 }
0x10a1   :  { %1382 = vrcp.f32 %v634_v1  ;;  %v646_v58 = vand.u32 2147483648, %v634_v1  ;;  %vm640_vm1 = vweird.f32 %v634_v1  ;;  %v644_v59 = vand.u32 2147483647, %v634_v1 }
0x10a3   :  { %v647_v60 = vor.u32 1.1754944e-38, %v646_v58  ;;  %vm645_vm3 = vcmp.eq.f32.partialorder %v644_v59, 8.507059e+37 }
0x10a7   :  { %v1383_v3 = vpop.eup %1382 }
0x10a8   :  { %v636_v56 = vmul.f32 %v1383_v3, %v634_v1  ;;  %vm641_vm15 = vweird.f32 %v1383_v3 }
0x10a9   :  { %vm642_vm2 = vmor %vm640_vm1, %vm641_vm15 }
0x10aa   :  { %v637_v5 = vsub.f32 1.0, %v636_v56 }
0x10ac   :  { %v638_v57 = vmul.f32 %v1383_v3, %v637_v5 }
0x10ae   :  { %v639_v7 = vadd.f32 %v1383_v3, %v638_v57 }
0x10b0   :  { %v643_v49 = vsel %vm642_vm2, %v1383_v3, %v639_v7 }
0x10b1   :  { %v648_v62 = vsel %vm645_vm3, %v647_v60, %v643_v49 }
0x10b2   :  { %v651_v0 = vmul.f32 %v648_v62, %v594_v41 }
0x110f   :  { %v654_v61 = vpop.permute.xlu1 %653 }
0x1110   :  { %v656_v63 = vmul.f32 %v654_v61, %v648_v62 }
0x1112   :  { %658 = vrot.lane.b32.xlu2 %v656_v63, %s1540_s2 }
0x116c   :  { %v659_v2 = vpop.permute.xlu2 %658 }
0x116d   :  { %v661_v4 = vadd.f32 %v659_v2, %v651_v0 }
0x116f   :  { %1384 = vtanh.f32 %v661_v4  ;;  %v716_v33 = vrot.slane %v661_v4, 6 }
0x1175   :  { %v1385_v6 = vpop.eup %1384 }
0x1176   :  { %664 = vrot.lane.b32.xlu0 %v1385_v6, %s1539_s18 }
0x11e8   :  { %v665_v8 = vpop.permute.xlu0 %664 }
0x11e9   :  { %v667_v9 = vmul.f32 %v665_v8, %v648_v62 }
0x11eb   :  { %v669_v10 = vrot.slane %v667_v9, 6 }
0x11ed   :  { %670 = vrot.lane.b32.xlu1 %v669_v10, %s1540_s2 }
0x125f   :  { %v671_v11 = vpop.permute.xlu1 %670 }
0x1260   :  { %1294 = vmatmul.msk.f32.vlgmr.msrb.gmra.mxu2 %vm133_vm5, %v671_v11 }
0x12e3   :  { %v691_v16 = vpop.f32.mrf.mxu2 }
0x12e4   :  { %v694_v17 = vadd.f32 %v691_v16, %v1749_v14 }
0x12e6   :  { %1386 = vtanh.f32 %v694_v17  ;;  %v1295_v20 = vmul.f32 -1.442695, %v694_v17 }
0x12e8   :  { %1388 = vpow2.f32 %v1295_v20 }
0x12ec   :  { %v1387_v18 = vpop.eup %1386 }
0x12ed   :  { %720 = vrot.lane.b32.xlu2 %v1387_v18, %s1539_s18 }
0x12ee   :  { %v1389_v21 = vpop.eup %1388 }
0x12ef   :  { %v698_v22 = vadd.f32 1.0, %v1389_v21 }
0x12f1   :  { %1390 = vrcp.f32 %v698_v22  ;;  %v710_v13 = vand.u32 2147483648, %v698_v22  ;;  %vm704_vm6 = vweird.f32 %v698_v22  ;;  %v708_v19 = vand.u32 2147483647, %v698_v22 }
0x12f3   :  { %v711_v29 = vor.u32 1.1754944e-38, %v710_v13  ;;  %vm709_vm8 = vcmp.eq.f32.partialorder %v708_v19, 8.507059e+37 }
0x12f7   :  { %v1391_v23 = vpop.eup %1390 }
0x12f8   :  { %v700_v24 = vmul.f32 %v1391_v23, %v698_v22  ;;  %vm705_vm4 = vweird.f32 %v1391_v23 }
0x12f9   :  { %vm706_vm7 = vmor %vm704_vm6, %vm705_vm4 }
0x12fa   :  { %v701_v25 = vsub.f32 1.0, %v700_v24 }
0x12fc   :  { %v702_v26 = vmul.f32 %v1391_v23, %v701_v25 }
0x12fe   :  { %v703_v27 = vadd.f32 %v1391_v23, %v702_v26 }
0x1300   :  { %v707_v28 = vsel %vm706_vm7, %v1391_v23, %v703_v27 }
0x1301   :  { %v712_v31 = vsel %vm709_vm8, %v711_v29, %v707_v28 }
0x1302   :  { %v718_v15 = vmul.f32 %v716_v33, %v712_v31 }
0x1347   :  { %v721_v30 = vpop.permute.xlu2 %720 }
0x1348   :  { %v723_v32 = vmul.f32 %v721_v30, %v712_v31 }
0x134a   :  { %725 = vrot.lane.b32.xlu0 %v723_v32, %s1540_s2 }
0x13bc   :  { %v726_v34 = vpop.permute.xlu0 %725 }
0x13bd   :  { %v728_v35 = vadd.f32 %v726_v34, %v718_v15 }
0x13bf   :  { %1392 = vtanh.f32 %v728_v35 }
0x13c5   :  { %v1393_v36 = vpop.eup %1392 }
0x13c6   :  { %731 = vrot.lane.b32.xlu1 %v1393_v36, %s1539_s18 }
0x1438   :  { %v732_v37 = vpop.permute.xlu1 %731 }
0x1439   :  { %v734_v38 = vmul.f32 %v732_v37, %v712_v31 }
0x143b   :  { %736 = vrot.lane.b32.xlu2 %v734_v38, %s1540_s2 }
0x1495   :  { %v737_v39 = vpop.permute.xlu2 %736 }
0x1496   :  { %1296 = vmatmul.msk.f32.vlgmr.msrb.gmra.mxu3 %vm133_vm5, %v737_v39 }
0x1519   :  { %v757_v41 = vpop.f32.mrf.mxu3 }
0x151a   :  { %v760_v42 = vadd.f32 %v757_v41, %v1760_v40 }
0x151c   :  { %1394 = vtanh.f32 %v760_v42  ;;  %v1297_v44 = vmul.f32 -1.442695, %v760_v42 }
0x151e   :  { %1396 = vpow2.f32 %v1297_v44 }
0x1522   :  { %v1395_v43 = vpop.eup %1394 }
0x1523   :  { %783 = vrot.lane.b32.xlu0 %v1395_v43, %s1539_s18 }
0x1524   :  { %v1397_v45 = vpop.eup %1396 }
0x1525   :  { %v764_v46 = vadd.f32 1.0, %v1397_v45 }
0x1527   :  { %1398 = vrcp.f32 %v764_v46  ;;  %v776_v47 = vand.u32 2147483648, %v764_v46  ;;  %vm770_vm10 = vweird.f32 %v764_v46  ;;  %v774_v48 = vand.u32 2147483647, %v764_v46 }
0x1529   :  { %v777_v55 = vor.u32 1.1754944e-38, %v776_v47  ;;  %vm775_vm0 = vcmp.eq.f32.partialorder %v774_v48, 8.507059e+37 }
0x152d   :  { %v1399_v50 = vpop.eup %1398 }
0x152e   :  { %v766_v51 = vmul.f32 %v1399_v50, %v764_v46  ;;  %vm771_vm9 = vweird.f32 %v1399_v50 }
0x152f   :  { %vm772_vm11 = vmor %vm770_vm10, %vm771_vm9 }
0x1530   :  { %v767_v52 = vsub.f32 1.0, %v766_v51 }
0x1532   :  { %v768_v53 = vmul.f32 %v1399_v50, %v767_v52 }
0x1534   :  { %v769_v12 = vadd.f32 %v1399_v50, %v768_v53 }
0x1536   :  { %v773_v54 = vsel %vm772_vm11, %v1399_v50, %v769_v12 }
0x1537   :  { %v778_v3 = vsel %vm775_vm0, %v777_v55, %v773_v54 }
0x1538   :  { %v781_v5 = vmul.f32 %v778_v3, %v728_v35 }
0x1595   :  { %v784_v1 = vpop.permute.xlu0 %783 }
0x1596   :  { %v786_v56 = vmul.f32 %v784_v1, %v778_v3 }
0x1598   :  { %788 = vrot.lane.b32.xlu1 %v786_v56, %s1540_s2 }
0x160a   :  { %v789_v57 = vpop.permute.xlu1 %788 }
0x160b   :  { %v791_v7 = vadd.f32 %v789_v57, %v781_v5 }
0x160d   :  { %1400 = vtanh.f32 %v791_v7  ;;  %v848_v25 = vrot.slane %v791_v7, 6 }
0x1613   :  { %v1401_v58 = vpop.eup %1400 }
0x1614   :  { %794 = vrot.lane.b32.xlu2 %v1401_v58, %s1539_s18 }
0x166e   :  { %v795_v59 = vpop.permute.xlu2 %794 }
0x166f   :  { %v797_v49 = vmul.f32 %v795_v59, %v778_v3 }
0x1671   :  { %799 = vrot.lane.b32.xlu0 %v797_v49, %s1540_s2 }
0x16e3   :  { %v800_v60 = vpop.permute.xlu0 %799 }
0x16e4   :  { %1298 = vmatmul.msk.f32.vlgmr.msra.gmra.mxu0 %vm133_vm5, %v800_v60 }
0x1761   :  { %v820_v61 = vpop.f32.mrf.mxu0 }
0x1762   :  { %v824_v62 = vrot.slane %v820_v61, 6 }
0x1764   :  { %v826_v63 = vadd.f32 %v824_v62, %v1749_v14 }
0x1766   :  { %1402 = vtanh.f32 %v826_v63  ;;  %v1299_v2 = vmul.f32 -1.442695, %v826_v63 }
0x1768   :  { %1404 = vpow2.f32 %v1299_v2 }
0x176c   :  { %v1403_v0 = vpop.eup %1402 }
0x176d   :  { %852 = vrot.lane.b32.xlu1 %v1403_v0, %s1539_s18 }
0x176e   :  { %v1405_v4 = vpop.eup %1404 }
0x176f   :  { %v830_v6 = vadd.f32 1.0, %v1405_v4 }
0x1771   :  { %1406 = vrcp.f32 %v830_v6  ;;  %v842_v17 = vand.u32 2147483648, %v830_v6  ;;  %vm836_vm13 = vweird.f32 %v830_v6  ;;  %v840_v18 = vand.u32 2147483647, %v830_v6 }
0x1773   :  { %v843_v21 = vor.u32 1.1754944e-38, %v842_v17  ;;  %vm841_vm15 = vcmp.eq.f32.partialorder %v840_v18, 8.507059e+37 }
0x1777   :  { %v1407_v8 = vpop.eup %1406 }
0x1778   :  { %v832_v9 = vmul.f32 %v1407_v8, %v830_v6  ;;  %vm837_vm12 = vweird.f32 %v1407_v8 }
0x1779   :  { %vm838_vm14 = vmor %vm836_vm13, %vm837_vm12 }
0x177a   :  { %v833_v10 = vsub.f32 1.0, %v832_v9 }
0x177c   :  { %v834_v11 = vmul.f32 %v1407_v8, %v833_v10 }
0x177e   :  { %v835_v16 = vadd.f32 %v1407_v8, %v834_v11 }
0x1780   :  { %v839_v20 = vsel %vm838_vm14, %v1407_v8, %v835_v16 }
0x1781   :  { %v844_v23 = vsel %vm841_vm15, %v843_v21, %v839_v20 }
0x1782   :  { %v850_v26 = vmul.f32 %v848_v25, %v844_v23 }
0x17df   :  { %v853_v22 = vpop.permute.xlu1 %852 }
0x17e0   :  { %v855_v24 = vmul.f32 %v853_v22, %v844_v23 }
0x17e2   :  { %857 = vrot.lane.b32.xlu2 %v855_v24, %s1540_s2 }
0x183c   :  { %v858_v27 = vpop.permute.xlu2 %857 }
0x183d   :  { %v860_v13 = vadd.f32 %v858_v27, %v850_v26 }
0x183f   :  { %1408 = vtanh.f32 %v860_v13 }
0x1845   :  { %v1409_v19 = vpop.eup %1408 }
0x1846   :  { %863 = vrot.lane.b32.xlu0 %v1409_v19, %s1539_s18 }
0x18b8   :  { %v864_v28 = vpop.permute.xlu0 %863 }
0x18b9   :  { %v866_v29 = vmul.f32 %v864_v28, %v844_v23 }
0x18bb   :  { %v868_v30 = vrot.slane %v866_v29, 2 }
0x18bd   :  { %869 = vrot.lane.b32.xlu1 %v868_v30, %s1540_s2 }
0x192f   :  { %v870_v31 = vpop.permute.xlu1 %869 }
0x1930   :  { %1300 = vmatmul.msk.f32.vlgmr.msra.gmra.mxu1 %vm133_vm5, %v870_v31 }
0x19ad   :  { %v890_v32 = vpop.f32.mrf.mxu1 }
0x19ae   :  { %v894_v33 = vrot.slane %v890_v32, 6 }
0x19b0   :  { %v896_v15 = vadd.f32 %v894_v33, %v1760_v40 }
0x19b2   :  { %1410 = vtanh.f32 %v896_v15  ;;  %v1301_v35 = vmul.f32 -1.442695, %v896_v15 }
0x19b4   :  { %1412 = vpow2.f32 %v1301_v35 }
0x19b8   :  { %v1411_v34 = vpop.eup %1410 }
0x19b9   :  { %919 = vrot.lane.b32.xlu2 %v1411_v34, %s1539_s18 }
0x19ba   :  { %v1413_v36 = vpop.eup %1412 }
0x19bb   :  { %v900_v37 = vadd.f32 1.0, %v1413_v36 }
0x19bd   :  { %1414 = vrcp.f32 %v900_v37  ;;  %v912_v44 = vand.u32 2147483648, %v900_v37  ;;  %vm906_vm2 = vweird.f32 %v900_v37  ;;  %v910_v45 = vand.u32 2147483647, %v900_v37 }
0x19bf   :  { %v913_v50 = vor.u32 1.1754944e-38, %v912_v44  ;;  %vm911_vm4 = vcmp.eq.f32.partialorder %v910_v45, 8.507059e+37 }
0x19c3   :  { %v1415_v38 = vpop.eup %1414 }
0x19c4   :  { %v902_v39 = vmul.f32 %v1415_v38, %v900_v37  ;;  %vm907_vm1 = vweird.f32 %v1415_v38 }
0x19c5   :  { %vm908_vm3 = vmor %vm906_vm2, %vm907_vm1 }
0x19c6   :  { %v903_v41 = vsub.f32 1.0, %v902_v39 }
0x19c8   :  { %v904_v42 = vmul.f32 %v1415_v38, %v903_v41 }
0x19ca   :  { %v905_v43 = vadd.f32 %v1415_v38, %v904_v42 }
0x19cc   :  { %v909_v46 = vsel %vm908_vm3, %v1415_v38, %v905_v43 }
0x19cd   :  { %v914_v52 = vsel %vm911_vm4, %v913_v50, %v909_v46 }
0x19ce   :  { %v917_v12 = vmul.f32 %v914_v52, %v860_v13 }
0x1a13   :  { %v920_v51 = vpop.permute.xlu2 %919 }
0x1a14   :  { %v922_v53 = vmul.f32 %v920_v51, %v914_v52 }
0x1a16   :  { %924 = vrot.lane.b32.xlu0 %v922_v53, %s1540_s2 }
0x1a88   :  { %v925_v47 = vpop.permute.xlu0 %924 }
0x1a89   :  { %v927_v48 = vadd.f32 %v925_v47, %v917_v12 }
0x1a8b   :  { %1416 = vtanh.f32 %v927_v48  ;;  %v985_v17 = vrot.slane %v927_v48, 6 }
0x1a91   :  { %v1417_v54 = vpop.eup %1416 }
0x1a92   :  { %930 = vrot.lane.b32.xlu1 %v1417_v54, %s1539_s18 }
0x1b04   :  { %v931_v55 = vpop.permute.xlu1 %930 }
0x1b05   :  { %v933_v1 = vmul.f32 %v931_v55, %v914_v52 }
0x1b07   :  { %v935_v3 = vrot.slane %v933_v1, 2 }
0x1b09   :  { %936 = vrot.lane.b32.xlu2 %v935_v3, %s1540_s2 }
0x1b63   :  { %v937_v56 = vpop.permute.xlu2 %936 }
0x1b64   :  { %1302 = vmatmul.msk.f32.vlgmr.msra.gmra.mxu2 %vm133_vm5, %v937_v56 }
0x1be7   :  { %v957_v5 = vpop.f32.mrf.mxu2 }
0x1be8   :  { %v961_v57 = vrot.slane %v957_v5, 4 }
0x1bea   :  { %v963_v7 = vadd.f32 %v961_v57, %v1749_v14 }
0x1bec   :  { %1418 = vtanh.f32 %v963_v7  ;;  %v1303_v59 = vmul.f32 -1.442695, %v963_v7 }
0x1bee   :  { %1420 = vpow2.f32 %v1303_v59 }
0x1bf2   :  { %v1419_v58 = vpop.eup %1418 }
0x1bf3   :  { %989 = vrot.lane.b32.xlu0 %v1419_v58, %s1539_s18 }
0x1bf4   :  { %v1421_v49 = vpop.eup %1420 }
0x1bf5   :  { %v967_v60 = vadd.f32 1.0, %v1421_v49 }
0x1bf7   :  { %1422 = vrcp.f32 %v967_v60  ;;  %v979_v4 = vand.u32 2147483648, %v967_v60  ;;  %vm973_vm7 = vweird.f32 %v967_v60  ;;  %v977_v6 = vand.u32 2147483647, %v967_v60 }
0x1bf9   :  { %v980_v9 = vor.u32 1.1754944e-38, %v979_v4  ;;  %vm978_vm9 = vcmp.eq.f32.partialorder %v977_v6, 8.507059e+37 }
0x1bfd   :  { %v1423_v61 = vpop.eup %1422 }
0x1bfe   :  { %v969_v62 = vmul.f32 %v1423_v61, %v967_v60  ;;  %vm974_vm6 = vweird.f32 %v1423_v61 }
0x1bff   :  { %vm975_vm8 = vmor %vm973_vm7, %vm974_vm6  ;;  %vm1242_vm7 = vcmask 9216  }
0x1c00   :  { %v970_v63 = vsub.f32 1.0, %v969_v62 }
0x1c02   :  { %v971_v0 = vmul.f32 %v1423_v61, %v970_v63 }
0x1c04   :  { %v972_v2 = vadd.f32 %v1423_v61, %v971_v0 }
0x1c06   :  { %v976_v8 = vsel %vm975_vm8, %v1423_v61, %v972_v2 }
0x1c07   :  { %v981_v11 = vsel %vm978_vm9, %v980_v9, %v976_v8 }
0x1c08   :  { %v987_v18 = vmul.f32 %v985_v17, %v981_v11 }
0x1c65   :  { %v990_v10 = vpop.permute.xlu0 %989 }
0x1c66   :  { %v992_v16 = vmul.f32 %v990_v10, %v981_v11 }
0x1c68   :  { %994 = vrot.lane.b32.xlu1 %v992_v16, %s1540_s2 }
0x1cda   :  { %v995_v20 = vpop.permute.xlu1 %994 }
0x1cdb   :  { %v997_v21 = vadd.f32 %v995_v20, %v987_v18 }
0x1cdd   :  { %1424 = vtanh.f32 %v997_v21 }
0x1ce3   :  { %v1425_v22 = vpop.eup %1424 }
0x1ce4   :  { %1000 = vrot.lane.b32.xlu2 %v1425_v22, %s1539_s18 }
0x1d3e   :  { %v1001_v23 = vpop.permute.xlu2 %1000 }
0x1d3f   :  { %v1003_v24 = vmul.f32 %v1001_v23, %v981_v11 }
0x1d41   :  { %v1005_v25 = vrot.slane %v1003_v24, 4 }
0x1d43   :  { %1006 = vrot.lane.b32.xlu0 %v1005_v25, %s1540_s2 }
0x1db5   :  { %v1007_v26 = vpop.permute.xlu0 %1006 }
0x1db6   :  { %1304 = vmatmul.msk.f32.vlgmr.msra.gmra.mxu3 %vm133_vm5, %v1007_v26 }
0x1e39   :  { %v1027_v27 = vpop.f32.mrf.mxu3 }
0x1e3a   :  { %v1031_v13 = vrot.slane %v1027_v27, 4 }
0x1e3c   :  { %v1033_v19 = vadd.f32 %v1031_v13, %v1760_v40 }
0x1e3e   :  { %1426 = vtanh.f32 %v1033_v19  ;;  %v1305_v29 = vmul.f32 -1.442695, %v1033_v19 }
0x1e40   :  { %1428 = vpow2.f32 %v1305_v29 }
0x1e44   :  { %v1427_v28 = vpop.eup %1426 }
0x1e45   :  { %1056 = vrot.lane.b32.xlu1 %v1427_v28, %s1539_s18 }
0x1e46   :  { %v1429_v30 = vpop.eup %1428 }
0x1e47   :  { %v1037_v31 = vadd.f32 1.0, %v1429_v30 }
0x1e49   :  { %1430 = vrcp.f32 %v1037_v31  ;;  %v1049_v36 = vand.u32 2147483648, %v1037_v31  ;;  %vm1043_vm11 = vweird.f32 %v1037_v31  ;;  %v1047_v37 = vand.u32 2147483647, %v1037_v31 }
0x1e4b   :  { %v1050_v39 = vor.u32 1.1754944e-38, %v1049_v36  ;;  %vm1048_vm12 = vcmp.eq.f32.partialorder %v1047_v37, 8.507059e+37 }
0x1e4f   :  { %v1431_v32 = vpop.eup %1430 }
0x1e50   :  { %v1039_v33 = vmul.f32 %v1431_v32, %v1037_v31  ;;  %vm1044_vm10 = vweird.f32 %v1431_v32 }
0x1e51   :  { %vm1045_vm0 = vmor %vm1043_vm11, %vm1044_vm10 }
0x1e52   :  { %v1040_v15 = vsub.f32 1.0, %v1039_v33 }
0x1e54   :  { %v1041_v34 = vmul.f32 %v1431_v32, %v1040_v15 }
0x1e56   :  { %v1042_v35 = vadd.f32 %v1431_v32, %v1041_v34 }
0x1e58   :  { %v1046_v38 = vsel %vm1045_vm0, %v1431_v32, %v1042_v35 }
0x1e59   :  { %v1051_v42 = vsel %vm1048_vm12, %v1050_v39, %v1046_v38  ;;  %v1211_v38 = vld [vmem:[%s1829_s4 + $0x18] sm:$0xff]  ;;  %v1210_v39 = vld [vmem:[%s1829_s4 + $0x10] sm:$0xff] }
0x1e5a   :  { %v1054_v44 = vmul.f32 %v1051_v42, %v997_v21  ;;  %1234 = vmatpush.msrb.mxu2 %v1211_v38 }
0x1e5c   :  { %1235 = vmatpush.msrb.mxu2 %v1210_v39 }
0x1eb7   :  { %v1057_v41 = vpop.permute.xlu1 %1056 }
0x1eb8   :  { %v1059_v43 = vmul.f32 %v1057_v41, %v1051_v42  ;;  %v1209_v41 = vld [vmem:[%s1829_s4 + $0x8] sm:$0xff] }
0x1eb9   :  { %1236 = vmatpush.msrb.mxu2 %v1209_v41 }
0x1eba   :  { %1061 = vrot.lane.b32.xlu2 %v1059_v43, %s1540_s2 }
0x1f14   :  { %v1062_v45 = vpop.permute.xlu2 %1061 }
0x1f15   :  { %v1064_v46 = vadd.f32 %v1062_v45, %v1054_v44 }
0x1f17   :  { %1432 = vtanh.f32 %v1064_v46  ;;  %v1122_v2 = vrot.slane %v1064_v46, 6 }
0x1f1d   :  { %v1433_v50 = vpop.eup %1432 }
0x1f1e   :  { %1067 = vrot.lane.b32.xlu0 %v1433_v50, %s1539_s18  ;;  %v1321_v50 = vld [vmem:[%s1830_s5] ss:$0 sm:$0xff] }
0x1f90   :  { %v1068_v51 = vpop.permute.xlu0 %1067 }
0x1f91   :  { %v1070_v52 = vmul.f32 %v1068_v51, %v1051_v42  ;;  %v1208_v42 = vld [vmem:[%s1829_s4] sm:$0xff]  ;;  %s1541_s4 = smov [#allocation7]  }
0x1f92   :  { %1237 = vmatpush.msrb.mxu2 %v1208_v42  ;;  %s1262_s5 = sshll.u32 %s1541_s4, 4  ;;  %s1263_s5 = int_to_ptr.vmem [resolvable:$true] %s1262_s5 }
0x1f93   :  { %v1072_v53 = vrot.slane %v1070_v52, 4 }
0x1f95   :  { %1073 = vrot.lane.b32.xlu1 %v1072_v53, %s1540_s2 }
0x2007   :  { %v1074_v12 = vpop.permute.xlu1 %1073 }
0x2008   :  { %1306 = vmatmul.msk.f32.vlgmr.msrb.gmra.mxu0 %vm133_vm5, %v1074_v12 }
0x2085   :  { %v1094_v47 = vpop.f32.mrf.mxu0 }
0x2086   :  { %v1098_v48 = vrot.slane %v1094_v47, 2 }
0x2088   :  { %v1100_v54 = vadd.f32 %v1098_v48, %v1749_v14 }
0x208a   :  { %1434 = vtanh.f32 %v1100_v54  ;;  %v1307_v1 = vmul.f32 -1.442695, %v1100_v54 }
0x208c   :  { %1436 = vpow2.f32 %v1307_v1 }
0x2090   :  { %v1435_v55 = vpop.eup %1434 }
0x2091   :  { %1126 = vrot.lane.b32.xlu2 %v1435_v55, %s1539_s18 }
0x2092   :  { %v1437_v3 = vpop.eup %1436 }
0x2093   :  { %v1104_v56 = vadd.f32 1.0, %v1437_v3 }
0x2095   :  { %1438 = vrcp.f32 %v1104_v56  ;;  %v1116_v49 = vand.u32 2147483648, %v1104_v56  ;;  %vm1110_vm14 = vweird.f32 %v1104_v56  ;;  %v1114_v60 = vand.u32 2147483647, %v1104_v56 }
0x2097   :  { %v1117_v61 = vor.u32 1.1754944e-38, %v1116_v49  ;;  %vm1115_vm1 = vcmp.eq.f32.partialorder %v1114_v60, 8.507059e+37 }
0x209b   :  { %v1439_v5 = vpop.eup %1438 }
0x209c   :  { %v1106_v57 = vmul.f32 %v1439_v5, %v1104_v56  ;;  %vm1111_vm13 = vweird.f32 %v1439_v5 }
0x209d   :  { %vm1112_vm15 = vmor %vm1110_vm14, %vm1111_vm13 }
0x209e   :  { %v1107_v7 = vsub.f32 1.0, %v1106_v57 }
0x20a0   :  { %v1108_v58 = vmul.f32 %v1439_v5, %v1107_v7 }
0x20a2   :  { %v1109_v59 = vadd.f32 %v1439_v5, %v1108_v58 }
0x20a4   :  { %v1113_v14 = vsel %vm1112_vm15, %v1439_v5, %v1109_v59 }
0x20a5   :  { %v1118_v63 = vsel %vm1115_vm1, %v1117_v61, %v1113_v14 }
0x20a6   :  { %v1124_v4 = vmul.f32 %v1122_v2, %v1118_v63 }
0x20eb   :  { %v1127_v62 = vpop.permute.xlu2 %1126 }
0x20ec   :  { %v1129_v0 = vmul.f32 %v1127_v62, %v1118_v63 }
0x20ee   :  { %1131 = vrot.lane.b32.xlu0 %v1129_v0, %s1540_s2 }
0x2160   :  { %v1132_v6 = vpop.permute.xlu0 %1131 }
0x2161   :  { %v1134_v8 = vadd.f32 %v1132_v6, %v1124_v4 }
0x2163   :  { %1440 = vtanh.f32 %v1134_v8 }
0x2169   :  { %v1441_v9 = vpop.eup %1440 }
0x216a   :  { %1137 = vrot.lane.b32.xlu1 %v1441_v9, %s1539_s18 }
0x21dc   :  { %v1138_v10 = vpop.permute.xlu1 %1137 }
0x21dd   :  { %v1140_v11 = vmul.f32 %v1138_v10, %v1118_v63 }
0x21df   :  { %v1142_v16 = vrot.slane %v1140_v11, 6 }
0x21e1   :  { %1143 = vrot.lane.b32.xlu2 %v1142_v16, %s1540_s2 }
0x223b   :  { %v1144_v17 = vpop.permute.xlu2 %1143 }
0x223c   :  { %1308 = vmatmul.msk.f32.vlgmr.msrb.gmra.mxu1 %vm133_vm5, %v1144_v17 }
0x22b9   :  { %v1164_v18 = vpop.f32.mrf.mxu1 }
0x22ba   :  { %v1168_v20 = vrot.slane %v1164_v18, 2 }
0x22bc   :  { %v1170_v21 = vadd.f32 %v1168_v20, %v1760_v40 }
0x22be   :  { %1442 = vtanh.f32 %v1170_v21  ;;  %v1309_v23 = vmul.f32 -1.442695, %v1170_v21 }
0x22c0   :  { %1444 = vpow2.f32 %v1309_v23 }
0x22c4   :  { %v1443_v22 = vpop.eup %1442 }
0x22c5   :  { %1193 = vrot.lane.b32.xlu0 %v1443_v22, %s1539_s18 }
0x22c6   :  { %v1445_v24 = vpop.eup %1444 }
0x22c7   :  { %v1174_v25 = vadd.f32 1.0, %v1445_v24 }
0x22c9   :  { %1446 = vrcp.f32 %v1174_v25  ;;  %v1186_v29 = vand.u32 2147483648, %v1174_v25  ;;  %vm1180_vm3 = vweird.f32 %v1174_v25  ;;  %v1184_v30 = vand.u32 2147483647, %v1174_v25 }
0x22cb   :  { %v1187_v31 = vor.u32 1.1754944e-38, %v1186_v29  ;;  %vm1185_vm6 = vcmp.eq.f32.partialorder %v1184_v30, 8.507059e+37 }
0x22cf   :  { %v1447_v26 = vpop.eup %1446 }
0x22d0   :  { %v1176_v27 = vmul.f32 %v1447_v26, %v1174_v25  ;;  %vm1181_vm2 = vweird.f32 %v1447_v26 }
0x22d1   :  { %vm1182_vm4 = vmor %vm1180_vm3, %vm1181_vm2 }
0x22d2   :  { %v1177_v13 = vsub.f32 1.0, %v1176_v27 }
0x22d4   :  { %v1178_v19 = vmul.f32 %v1447_v26, %v1177_v13 }
0x22d6   :  { %v1179_v28 = vadd.f32 %v1447_v26, %v1178_v19 }
0x22d8   :  { %v1183_v40 = vsel %vm1182_vm4, %v1447_v26, %v1179_v28 }
0x22d9   :  { %v1188_v33 = vsel %vm1185_vm6, %v1187_v31, %v1183_v40 }
0x22da   :  { %v1191_v34 = vmul.f32 %v1188_v33, %v1134_v8 }
0x2337   :  { %v1194_v32 = vpop.permute.xlu0 %1193 }
0x2338   :  { %v1196_v15 = vmul.f32 %v1194_v32, %v1188_v33 }
0x233a   :  { %1198 = vrot.lane.b32.xlu1 %v1196_v15, %s1540_s2 }
0x23ac   :  { %v1199_v35 = vpop.permute.xlu1 %1198 }
0x23ad   :  { %v1201_v36 = vadd.f32 %v1199_v35, %v1191_v34 }
0x23af   :  { %1448 = vtanh.f32 %v1201_v36 }
0x23b5   :  { %v1449_v37 = vpop.eup %1448 }
0x23b6   :  { %1204 = vrot.lane.b32.xlu2 %v1449_v37, %s1539_s18 }
0x2410   :  { %v1205_v43 = vpop.permute.xlu2 %1204 }
0x2411   :  { %v1207_v44 = vmul.f32 %v1205_v43, %v1188_v33 }
0x2413   :  { %v1217_v45 = vrot.slane %v1207_v44, 6 }
0x2415   :  { %1218 = vrot.lane.b32.xlu0 %v1217_v45, %s1540_s2 }
0x2487   :  { %v1219_v46 = vpop.permute.xlu0 %1218 }
0x2488   :  { %1310 = vmatmul.msk.f32.vlgmr.msrb.gmra.mxu2 %vm133_vm5, %v1219_v46 }
0x250b   :  { %v1239_v51 = vpop.f32.mrf.mxu2 }
0x250c   :  { %v1240_v52 = vadd.f32 %v1321_v50, %v1239_v51 }
0x250e   :  { %v1243_v53 = vsel %vm1242_vm7, %v1240_v52, -inf }
0x250f   :  { %1244 = vmax.xlane.f32.xlu1 %v1243_v53 }
0x2582   :  { %v1245_v12 = vpop.xlane.xlu1 %1244 }
0x2583   :  { %v1246_v47 = vsub.f32 %v1240_v52, %v1245_v12 }
0x2585   :  { %v1247_v48 = vmul.f32 1.442695, %v1246_v47 }
0x2587   :  { %1450 = vpow2.f32 %v1247_v48 }
0x258d   :  { %v1451_v54 = vpop.eup %1450 }
0x258e   :  { %v1249_v55 = vsel %vm1242_vm7, %v1451_v54, 0.0 }
0x258f   :  { %1250 = vadd.xlane.f32.xlu2 %v1249_v55 }
0x2602   :  { %v1251_v1 = vpop.xlane.xlu2 %1250 }
0x2603   :  { %1452 = vlog2.f32 %v1251_v1 }
0x2609   :  { %v1453_v3 = vpop.eup %1452 }
0x260a   :  { %v1253_v56 = vmul.f32 0.6931472, %v1453_v3 }
0x260c   :  { %v1254_v5 = vadd.f32 %v1253_v56, %v1245_v12 }
0x260e   :  { %v1255_v57 = vsub.f32 %v1240_v52, %v1254_v5 }
0x2610   :  { %1256 = vst.msk [vmem:[#allocation7] sm:$0x3] %vm1242_vm7, %v1255_v57 }
0x2611   :  { %1267 = dma.vmem_to_hbm [thread:$0]  %s1263_s5, 32, %s1265_s7, [#allocation4]  }
0x2612   :  { %1530 = dma.done.wait [#allocation4], 32  }
0x2613   :  { %1531 = vsyncadd [#allocation4], 4294967264 }
0x2614   :  { %1272 = vsyncpa [#allocation3], 1 }
0x2615   :  { %1273 = vsyncpa [#allocation6], 1 }
0x2616   :  { %1274 = vsyncpa [#allocation4], 1 }

</bundles_post_ra>
